<compile_context>
chip_gen: v7x
topology: tpu7x:2x2x1
jax: 0.10.0
libtpu: 0.0.40
codegen_flags: <defaults>
</compile_context>

<pallas_src>
from functools import partial

import jax
import jax.numpy as jnp
from jax.experimental import pallas as pl
from jax.experimental.pallas import tpu as pltpu

BN_EPS = 1e-5
VMEM_LIMIT = 32 * 1024 * 1024          # safe scoped limit on v5e/v6e/v7x
PER_STEP_BYTES_BUDGET = 6 * 1024 * 1024  # per-block budget -> double-buffered << 32 MiB


def _pick_tile_h(Ho, Wo, Wp, Cin, Cout, row_tile_cap=None):
    """Pick a row-tile height that (a) divides Ho exactly (so BN statistics need no
    masking), (b) keeps the per-step blocks within the VMEM budget, and (c) gives
    the matmul at least ~128 M-rows when possible."""
    bytes_per_row = (Wp * Cin + Wo * Cout) * 4
    vmem_rows = max(8, PER_STEP_BYTES_BUDGET // max(bytes_per_row, 1))
    min_rows = -(-128 // max(Wo, 1))            # ceil(128 / Wo)
    cap = min(Ho, max(min_rows, vmem_rows))
    if row_tile_cap is not None:
        cap = min(cap, max(1, row_tile_cap))
    if Ho <= cap:
        return Ho
    best = None
    for th in range(cap, 0, -1):
        if Ho % th == 0:
            best = th
            break
    if best is None or best < min(8, Ho):
        return Ho                               # fallback: whole image rows
    return best


def _conv_stats_kernel(xp_ref, w_ref, y_ref, s1_ref, s2_ref, *, K):
    """Pass 1: fused depthwise+pointwise conv as ONE im2col MXU matmul for one
    (batch, row-tile) block, plus partial per-channel BN statistics.

    xp_ref: (1, tile_h + K - 1, Wp, Cin)   halo-padded input row tile (NHWC)
    w_ref:  (K*K*Cin, Cout)                folded weights  w[(kh*K+kw)*Cin+c, o]
    y_ref:  (1, tile_h, Wo, Cout)          conv output (f32)
    s1_ref: (1, 1, Cout)                   partial per-channel sum of y
    s2_ref: (1, 1, Cout)                   partial per-channel sum of y*y
    """
    _, th, Wo, Cout = y_ref.shape
    Cin = xp_ref.shape[-1]

    # im2col: slice the K*K shifted windows straight from the ref (static slices),
    # concatenate once -> (th, Wo, K*K*Cin) -> (th*Wo, K*K*Cin).
    windows = []
    for kh in range(K):
        for kw in range(K):
            windows.append(xp_ref[0, kh:kh + th, kw:kw + Wo, :])
    patches = windows[0] if len(windows) == 1 else jnp.concatenate(windows, axis=-1)
    patches = patches.reshape(th * Wo, K * K * Cin)

    # Single MXU matmul with contraction depth K*K*Cin, f32 accumulator.
    acc = jnp.dot(patches, w_ref[...], preferred_element_type=jnp.float32)

    # Partial BatchNorm statistics (combined over all grid steps in the wrapper).
    s1_ref[0] = jnp.sum(acc, axis=0, keepdims=True)        # (1, Cout)
    s2_ref[0] = jnp.sum(acc * acc, axis=0, keepdims=True)  # (1, Cout)

    y_ref[0] = acc.reshape(th, Wo, Cout)


def _bn_relu_kernel(y_ref, scale_ref, shift_ref, o_ref):
    """Pass 2: per-channel affine (precomputed BN scale/shift) + ReLU, written in
    place over y (input_output_aliases)."""
    Cout = o_ref.shape[-1]
    scale = scale_ref[...].reshape(1, 1, 1, Cout)
    shift = shift_ref[...].reshape(1, 1, 1, Cout)
    o_ref[...] = jnp.maximum(y_ref[...] * scale + shift, 0.0)


@partial(jax.jit, static_argnames=("padding", "row_tile_cap"))
def depthwise_separable_conv(x_nchw, dw_weight, pw_weight, gamma, beta, *,
                             padding=0, row_tile_cap=None):
    """x_nchw: (N, Cin, H, W); dw_weight: (Cin, 1, K, K); pw_weight: (Cout, Cin, 1, 1);
    gamma/beta: (Cout,).  Stride is 1 (module default).  Returns NCHW output."""
    N, Cin, H, W = x_nchw.shape
    Cout = pw_weight.shape[0]
    K = dw_weight.shape[-1]
    Hp, Wp = H + 2 * padding, W + 2 * padding
    Ho, Wo = Hp - (K - 1), Wp - (K - 1)

    th = _pick_tile_h(Ho, Wo, Wp, Cin, Cout, row_tile_cap)
    T = Ho // th                                     # row tiles per image
    kkc = K * K * Cin

    # --- layout glue (NCHW -> NHWC) + spatial pre-padding ---------------------
    x_nhwc = jnp.transpose(x_nchw, (0, 2, 3, 1)).astype(jnp.float32)
    x_pad = jnp.pad(x_nhwc, ((0, 0), (padding, padding), (padding, padding), (0, 0)))

    # Wrapper-side halo replication so each row tile is a plain Blocked block.
    if T == 1:
        x_tiles = x_pad                              # (N, Hp, Wp, Cin) == (N*T, th+K-1, ...)
    else:
        x_tiles = jnp.stack(
            [x_pad[:, t * th: t * th + th + K - 1] for t in range(T)], axis=1
        ).reshape(N * T, th + K - 1, Wp, Cin)

    # --- fold depthwise weights into the pointwise weights --------------------
    # w_eff[(kh*K+kw)*Cin + c, o] = dw[c, kh, kw] * pw[o, c]   (matches the im2col order)
    dw = jnp.transpose(dw_weight[:, 0, :, :], (1, 2, 0)).reshape(K * K, Cin)
    pw = jnp.transpose(pw_weight[:, :, 0, 0], (1, 0))                     # (Cin, Cout)
    w_eff = (dw[:, :, None] * pw[None, :, :]).reshape(kkc, Cout).astype(jnp.float32)

    cparams = pltpu.CompilerParams(
        dimension_semantics=("parallel", "parallel"),
        vmem_limit_bytes=VMEM_LIMIT,
    )
    grid = (N, T)

    # --- pass 1: im2col conv + partial BN statistics ---------------------------
    y, s1, s2 = pl.pallas_call(
        partial(_conv_stats_kernel, K=K),
        grid=grid,
        in_specs=[
            pl.BlockSpec((1, th + K - 1, Wp, Cin), lambda n, t: (n * T + t, 0, 0, 0)),
            pl.BlockSpec((kkc, Cout), lambda n, t: (0, 0)),
        ],
        out_specs=(
            pl.BlockSpec((1, th, Wo, Cout), lambda n, t: (n, t, 0, 0)),
            pl.BlockSpec((1, 1, Cout), lambda n, t: (n * T + t, 0, 0)),
            pl.BlockSpec((1, 1, Cout), lambda n, t: (n * T + t, 0, 0)),
        ),
        out_shape=(
            jax.ShapeDtypeStruct((N, Ho, Wo, Cout), jnp.float32),
            jax.ShapeDtypeStruct((N * T, 1, Cout), jnp.float32),
            jax.ShapeDtypeStruct((N * T, 1, Cout), jnp.float32),
        ),
        compiler_params=cparams,
    )(x_tiles, w_eff)

    # --- training-mode BN statistics (tiny per-channel math, plain JAX) -------
    count = jnp.float32(N * Ho * Wo)
    mean = jnp.sum(s1[:, 0, :], axis=0) / count                           # (Cout,)
    var = jnp.maximum(jnp.sum(s2[:, 0, :], axis=0) / count - mean * mean, 0.0)
    scale = gamma.astype(jnp.float32) * jax.lax.rsqrt(var + BN_EPS)       # (Cout,)
    shift = beta.astype(jnp.float32) - mean * scale                       # (Cout,)

    # --- pass 2: normalize + ReLU, written in place over y --------------------
    out_nhwc = pl.pallas_call(
        _bn_relu_kernel,
        grid=grid,
        in_specs=[
            pl.BlockSpec((1, th, Wo, Cout), lambda n, t: (n, t, 0, 0)),
            pl.BlockSpec((1, Cout), lambda n, t: (0, 0)),
            pl.BlockSpec((1, Cout), lambda n, t: (0, 0)),
        ],
        out_specs=pl.BlockSpec((1, th, Wo, Cout), lambda n, t: (n, t, 0, 0)),
        out_shape=jax.ShapeDtypeStruct((N, Ho, Wo, Cout), jnp.float32),
        input_output_aliases={0: 0},
        compiler_params=cparams,
    )(y, scale.reshape(1, Cout), shift.reshape(1, Cout))

    # back to NCHW (fuses with the surrounding ops under jit)
    return jnp.transpose(out_nhwc, (0, 3, 1, 2)).astype(x_nchw.dtype)


def _reference(x, dw_weight, pw_weight, gamma, beta, padding):
    """Pure-JAX reference mirroring the PyTorch forward (training-mode BN)."""
    dn = ("NCHW", "OIHW", "NCHW")
    y = jax.lax.conv_general_dilated(
        x, dw_weight, (1, 1), [(padding, padding)] * 2,
        feature_group_count=x.shape[1], dimension_numbers=dn)
    y = jax.lax.conv_general_dilated(
        y, pw_weight, (1, 1), "VALID", dimension_numbers=dn)
    mean = y.mean(axis=(0, 2, 3), keepdims=True)
    var = ((y - mean) ** 2).mean(axis=(0, 2, 3), keepdims=True)
    y = (y - mean) / jnp.sqrt(var + BN_EPS)
    y = y * gamma[None, :, None, None] + beta[None, :, None, None]
    return jnp.maximum(y, 0.0)


def _run_case(key, N, Cin, Cout, H, W, K, P, row_tile_cap=None):
    k1, k2, k3 = jax.random.split(key, 3)
    x = jax.random.normal(k1, (N, Cin, H, W), jnp.float32)
    dw_weight = 0.1 * jax.random.normal(k2, (Cin, 1, K, K), jnp.float32)
    pw_weight = 0.1 * jax.random.normal(k3, (Cout, Cin, 1, 1), jnp.float32)
    gamma = jnp.ones((Cout,), jnp.float32)   # BatchNorm2d default init
    beta = jnp.zeros((Cout,), jnp.float32)

    out = depthwise_separable_conv(x, dw_weight, pw_weight, gamma, beta,
                                   padding=P, row_tile_cap=row_tile_cap)
    out = jax.block_until_ready(out)

    ref = _reference(x, dw_weight, pw_weight, gamma, beta, P)
    Ho = H + 2 * P - (K - 1)
    Wo = W + 2 * P - (K - 1)
    assert out.shape == ref.shape == (N, Cout, Ho, Wo)
    assert jnp.allclose(out, ref, atol=1e-4, rtol=1e-4), "mismatch vs reference"


if __name__ == "__main__":
    key = jax.random.PRNGKey(0)
    k_a, k_b, k_c = jax.random.split(key, 3)

    # kernel_size=3, stride=1, padding=1 configuration (primary shapes)
    _run_case(k_a, N=2, Cin=4, Cout=8, H=16, W=16, K=3, P=1)
    # module-default configuration: kernel_size=1, stride=1, padding=0
    _run_case(k_b, N=2, Cin=4, Cout=8, H=16, W=16, K=1, P=0)
    # exercise the multi-row-tile + halo-replication path explicitly
    _run_case(k_c, N=2, Cin=4, Cout=8, H=32, W=16, K=3, P=1, row_tile_cap=8)

    print("KERNEL_OK")
</pallas_src>

<mosaic_0001>
module attributes {stable_mosaic.version = 11 : i64} {
  func.func @_conv_stats_kernel(%arg0: i32, %arg1: i32, %arg2: memref<1x18x18x4xf32, #tpu.memory_space<vmem>>, %arg3: memref<36x8xf32, #tpu.memory_space<vmem>>, %arg4: memref<1x16x16x8xf32, #tpu.memory_space<vmem>>, %arg5: memref<1x1x8xf32, #tpu.memory_space<vmem>>, %arg6: memref<1x1x8xf32, #tpu.memory_space<vmem>>) attributes {dimension_semantics = [#tpu.dimension_semantics<parallel>, #tpu.dimension_semantics<parallel>], iteration_bounds = array<i64: 2, 1>, scalar_prefetch = 0 : i64, scratch_operands = 0 : i64, tpu.core_type = #tpu.core_type<tc>, window_params = [{transform_indices = @transform_0, window_bounds = array<i64: 1, 18, 18, 4>}, {pipeline_mode = #tpu.pipeline_mode<synchronous>, transform_indices = @transform_1, window_bounds = array<i64: 36, 8>}, {transform_indices = @transform_2, window_bounds = array<i64: 1, 16, 16, 8>}, {transform_indices = @transform_3, window_bounds = array<i64: 1, 1, 8>}, {transform_indices = @transform_4, window_bounds = array<i64: 1, 1, 8>}]} {
    %c0 = arith.constant 0 : index
    %c0_0 = arith.constant 0 : index
    %c0_1 = arith.constant 0 : index
    %c0_2 = arith.constant 0 : index
    %0 = vector.load %arg2[%c0, %c0_0, %c0_1, %c0_2] : memref<1x18x18x4xf32, #tpu.memory_space<vmem>>, vector<1x16x16x4xf32>
    %1 = vector.shape_cast %0 : vector<1x16x16x4xf32> to vector<16x16x4xf32>
    %c0_3 = arith.constant 0 : index
    %c0_4 = arith.constant 0 : index
    %c1 = arith.constant 1 : index
    %c0_5 = arith.constant 0 : index
    %2 = vector.load %arg2[%c0_3, %c0_4, %c1, %c0_5] : memref<1x18x18x4xf32, #tpu.memory_space<vmem>>, vector<1x16x16x4xf32>
    %3 = vector.shape_cast %2 : vector<1x16x16x4xf32> to vector<16x16x4xf32>
    %c0_6 = arith.constant 0 : index
    %c0_7 = arith.constant 0 : index
    %c2 = arith.constant 2 : index
    %c0_8 = arith.constant 0 : index
    %4 = vector.load %arg2[%c0_6, %c0_7, %c2, %c0_8] : memref<1x18x18x4xf32, #tpu.memory_space<vmem>>, vector<1x16x16x4xf32>
    %5 = vector.shape_cast %4 : vector<1x16x16x4xf32> to vector<16x16x4xf32>
    %c0_9 = arith.constant 0 : index
    %c1_10 = arith.constant 1 : index
    %c0_11 = arith.constant 0 : index
    %c0_12 = arith.constant 0 : index
    %6 = vector.load %arg2[%c0_9, %c1_10, %c0_11, %c0_12] : memref<1x18x18x4xf32, #tpu.memory_space<vmem>>, vector<1x16x16x4xf32>
    %7 = vector.shape_cast %6 : vector<1x16x16x4xf32> to vector<16x16x4xf32>
    %c0_13 = arith.constant 0 : index
    %c1_14 = arith.constant 1 : index
    %c1_15 = arith.constant 1 : index
    %c0_16 = arith.constant 0 : index
    %8 = vector.load %arg2[%c0_13, %c1_14, %c1_15, %c0_16] : memref<1x18x18x4xf32, #tpu.memory_space<vmem>>, vector<1x16x16x4xf32>
    %9 = vector.shape_cast %8 : vector<1x16x16x4xf32> to vector<16x16x4xf32>
    %c0_17 = arith.constant 0 : index
    %c1_18 = arith.constant 1 : index
    %c2_19 = arith.constant 2 : index
    %c0_20 = arith.constant 0 : index
    %10 = vector.load %arg2[%c0_17, %c1_18, %c2_19, %c0_20] : memref<1x18x18x4xf32, #tpu.memory_space<vmem>>, vector<1x16x16x4xf32>
    %11 = vector.shape_cast %10 : vector<1x16x16x4xf32> to vector<16x16x4xf32>
    %c0_21 = arith.constant 0 : index
    %c2_22 = arith.constant 2 : index
    %c0_23 = arith.constant 0 : index
    %c0_24 = arith.constant 0 : index
    %12 = vector.load %arg2[%c0_21, %c2_22, %c0_23, %c0_24] : memref<1x18x18x4xf32, #tpu.memory_space<vmem>>, vector<1x16x16x4xf32>
    %13 = vector.shape_cast %12 : vector<1x16x16x4xf32> to vector<16x16x4xf32>
    %c0_25 = arith.constant 0 : index
    %c2_26 = arith.constant 2 : index
    %c1_27 = arith.constant 1 : index
    %c0_28 = arith.constant 0 : index
    %14 = vector.load %arg2[%c0_25, %c2_26, %c1_27, %c0_28] : memref<1x18x18x4xf32, #tpu.memory_space<vmem>>, vector<1x16x16x4xf32>
    %15 = vector.shape_cast %14 : vector<1x16x16x4xf32> to vector<16x16x4xf32>
    %c0_29 = arith.constant 0 : index
    %c2_30 = arith.constant 2 : index
    %c2_31 = arith.constant 2 : index
    %c0_32 = arith.constant 0 : index
    %16 = vector.load %arg2[%c0_29, %c2_30, %c2_31, %c0_32] : memref<1x18x18x4xf32, #tpu.memory_space<vmem>>, vector<1x16x16x4xf32>
    %17 = vector.shape_cast %16 : vector<1x16x16x4xf32> to vector<16x16x4xf32>
    %18 = tpu.concatenate %1, %3, %5, %7, %9, %11, %13, %15, %17 in 2 : vector<16x16x4xf32>, vector<16x16x4xf32>, vector<16x16x4xf32>, vector<16x16x4xf32>, vector<16x16x4xf32>, vector<16x16x4xf32>, vector<16x16x4xf32>, vector<16x16x4xf32>, vector<16x16x4xf32> -> vector<16x16x36xf32>
    %19 = vector.shape_cast %18 : vector<16x16x36xf32> to vector<256x36xf32>
    %c0_33 = arith.constant 0 : index
    %c0_34 = arith.constant 0 : index
    %20 = vector.load %arg3[%c0_33, %c0_34] : memref<36x8xf32, #tpu.memory_space<vmem>>, vector<36x8xf32>
    %cst = arith.constant dense<0.000000e+00> : vector<256x8xf32>
    %21 = tpu.matmul %19, %20, %cst {dimension_numbers = #tpu.dot_dimension_numbers<[1], [0], [0], [1], [0, 0, 1, 1], [], []>} : vector<256x36xf32>, vector<36x8xf32>, vector<256x8xf32> -> vector<256x8xf32>
    %cst_35 = arith.constant dense<0.000000e+00> : vector<8xf32>
    %22 = vector.multi_reduction <add>, %21, %cst_35 [0] : vector<256x8xf32> to vector<8xf32>
    %23 = vector.shape_cast %22 : vector<8xf32> to vector<1x8xf32>
    %c0_36 = arith.constant 0 : index
    %c0_37 = arith.constant 0 : index
    %c0_38 = arith.constant 0 : index
    %24 = vector.load %arg5[%c0_36, %c0_37, %c0_38] : memref<1x1x8xf32, #tpu.memory_space<vmem>>, vector<1x1x8xf32>
    %25 = vector.shape_cast %24 : vector<1x1x8xf32> to vector<1x8xf32>
    %26 = vector.shape_cast %23 : vector<1x8xf32> to vector<1x1x8xf32>
    tpu.vector_store %arg5[%c0_36, %c0_37, %c0_38], %26 {strides = array<i32>} : memref<1x1x8xf32, #tpu.memory_space<vmem>>, vector<1x1x8xf32>,
    %27 = arith.mulf %21, %21 : vector<256x8xf32>
    %cst_39 = arith.constant dense<0.000000e+00> : vector<8xf32>
    %28 = vector.multi_reduction <add>, %27, %cst_39 [0] : vector<256x8xf32> to vector<8xf32>
    %29 = vector.shape_cast %28 : vector<8xf32> to vector<1x8xf32>
    %c0_40 = arith.constant 0 : index
    %c0_41 = arith.constant 0 : index
    %c0_42 = arith.constant 0 : index
    %30 = vector.load %arg6[%c0_40, %c0_41, %c0_42] : memref<1x1x8xf32, #tpu.memory_space<vmem>>, vector<1x1x8xf32>
    %31 = vector.shape_cast %30 : vector<1x1x8xf32> to vector<1x8xf32>
    %32 = vector.shape_cast %29 : vector<1x8xf32> to vector<1x1x8xf32>
    tpu.vector_store %arg6[%c0_40, %c0_41, %c0_42], %32 {strides = array<i32>} : memref<1x1x8xf32, #tpu.memory_space<vmem>>, vector<1x1x8xf32>,
    %33 = vector.shape_cast %21 : vector<256x8xf32> to vector<16x16x8xf32>
    %c0_43 = arith.constant 0 : index
    %c0_44 = arith.constant 0 : index
    %c0_45 = arith.constant 0 : index
    %c0_46 = arith.constant 0 : index
    %34 = vector.load %arg4[%c0_43, %c0_44, %c0_45, %c0_46] : memref<1x16x16x8xf32, #tpu.memory_space<vmem>>, vector<1x16x16x8xf32>
    %35 = vector.shape_cast %34 : vector<1x16x16x8xf32> to vector<16x16x8xf32>
    %36 = vector.shape_cast %33 : vector<16x16x8xf32> to vector<1x16x16x8xf32>
    tpu.vector_store %arg4[%c0_43, %c0_44, %c0_45, %c0_46], %36 {strides = array<i32>} : memref<1x16x16x8xf32, #tpu.memory_space<vmem>>, vector<1x16x16x8xf32>,
    return
  }
  func.func @transform_0(%arg0: i32, %arg1: i32) -> (i32, i32, i32, i32) {
    %c1_i32 = arith.constant 1 : i32
    %0 = arith.muli %arg0, %c1_i32 : i32
    %1 = arith.addi %0, %arg1 : i32
    %c0_i32 = arith.constant 0 : i32
    %c0_i32_0 = arith.constant 0 : i32
    %c0_i32_1 = arith.constant 0 : i32
    %c0_i32_2 = arith.constant 0 : i32
    return %1, %c0_i32, %c0_i32_0, %c0_i32_1 : i32, i32, i32, i32
  }
  func.func @transform_1(%arg0: i32, %arg1: i32) -> (i32, i32) {
    %c0_i32 = arith.constant 0 : i32
    %c0_i32_0 = arith.constant 0 : i32
    %c0_i32_1 = arith.constant 0 : i32
    return %c0_i32, %c0_i32_0 : i32, i32
  }
  func.func @transform_2(%arg0: i32, %arg1: i32) -> (i32, i32, i32, i32) {
    %c0_i32 = arith.constant 0 : i32
    %c0_i32_0 = arith.constant 0 : i32
    %c0_i32_1 = arith.constant 0 : i32
    return %arg0, %arg1, %c0_i32, %c0_i32_0 : i32, i32, i32, i32
  }
  func.func @transform_3(%arg0: i32, %arg1: i32) -> (i32, i32, i32) {
    %c1_i32 = arith.constant 1 : i32
    %0 = arith.muli %arg0, %c1_i32 : i32
    %1 = arith.addi %0, %arg1 : i32
    %c0_i32 = arith.constant 0 : i32
    %c0_i32_0 = arith.constant 0 : i32
    %c0_i32_1 = arith.constant 0 : i32
    return %1, %c0_i32, %c0_i32_0 : i32, i32, i32
  }
  func.func @transform_4(%arg0: i32, %arg1: i32) -> (i32, i32, i32) {
    %c1_i32 = arith.constant 1 : i32
    %0 = arith.muli %arg0, %c1_i32 : i32
    %1 = arith.addi %0, %arg1 : i32
    %c0_i32 = arith.constant 0 : i32
    %c0_i32_0 = arith.constant 0 : i32
    %c0_i32_1 = arith.constant 0 : i32
    return %1, %c0_i32, %c0_i32_0 : i32, i32, i32
  }
}

module attributes {stable_mosaic.version = 11 : i64} {
  func.func @_bn_relu_kernel(%arg0: i32, %arg1: i32, %arg2: memref<1x16x16x8xf32, #tpu.memory_space<vmem>>, %arg3: memref<1x8xf32, #tpu.memory_space<vmem>>, %arg4: memref<1x8xf32, #tpu.memory_space<vmem>>, %arg5: memref<1x16x16x8xf32, #tpu.memory_space<vmem>>) attributes {dimension_semantics = [#tpu.dimension_semantics<parallel>, #tpu.dimension_semantics<parallel>], iteration_bounds = array<i64: 2, 1>, scalar_prefetch = 0 : i64, scratch_operands = 0 : i64, tpu.core_type = #tpu.core_type<tc>, window_params = [{transform_indices = @transform_0, window_bounds = array<i64: 1, 16, 16, 8>}, {pipeline_mode = #tpu.pipeline_mode<synchronous>, transform_indices = @transform_1, window_bounds = array<i64: 1, 8>}, {pipeline_mode = #tpu.pipeline_mode<synchronous>, transform_indices = @transform_2, window_bounds = array<i64: 1, 8>}, {transform_indices = @transform_3, window_bounds = array<i64: 1, 16, 16, 8>}]} {
    %c0 = arith.constant 0 : index
    %c0_0 = arith.constant 0 : index
    %0 = vector.load %arg3[%c0, %c0_0] : memref<1x8xf32, #tpu.memory_space<vmem>>, vector<1x8xf32>
    %1 = vector.shape_cast %0 : vector<1x8xf32> to vector<1x1x1x8xf32>
    %c0_1 = arith.constant 0 : index
    %c0_2 = arith.constant 0 : index
    %2 = vector.load %arg4[%c0_1, %c0_2] : memref<1x8xf32, #tpu.memory_space<vmem>>, vector<1x8xf32>
    %3 = vector.shape_cast %2 : vector<1x8xf32> to vector<1x1x1x8xf32>
    %c0_3 = arith.constant 0 : index
    %c0_4 = arith.constant 0 : index
    %c0_5 = arith.constant 0 : index
    %c0_6 = arith.constant 0 : index
    %4 = vector.load %arg2[%c0_3, %c0_4, %c0_5, %c0_6] : memref<1x16x16x8xf32, #tpu.memory_space<vmem>>, vector<1x16x16x8xf32>
    %5 = vector.broadcast %1 : vector<1x1x1x8xf32> to vector<1x16x16x8xf32>
    %6 = arith.mulf %4, %5 : vector<1x16x16x8xf32>
    %7 = vector.broadcast %3 : vector<1x1x1x8xf32> to vector<1x16x16x8xf32>
    %8 = arith.addf %6, %7 : vector<1x16x16x8xf32>
    %cst = arith.constant 0.000000e+00 : f32
    %9 = vector.broadcast %cst : f32 to vector<1x16x16x8xf32>
    %10 = arith.maximumf %8, %9 : vector<1x16x16x8xf32>
    %c0_7 = arith.constant 0 : index
    %c0_8 = arith.constant 0 : index
    %c0_9 = arith.constant 0 : index
    %c0_10 = arith.constant 0 : index
    %11 = vector.load %arg5[%c0_7, %c0_8, %c0_9, %c0_10] : memref<1x16x16x8xf32, #tpu.memory_space<vmem>>, vector<1x16x16x8xf32>
    tpu.vector_store %arg5[%c0_7, %c0_8, %c0_9, %c0_10], %10 {strides = array<i32>} : memref<1x16x16x8xf32, #tpu.memory_space<vmem>>, vector<1x16x16x8xf32>,
    return
  }
  func.func @transform_0(%arg0: i32, %arg1: i32) -> (i32, i32, i32, i32) {
    %c0_i32 = arith.constant 0 : i32
    %c0_i32_0 = arith.constant 0 : i32
    %c0_i32_1 = arith.constant 0 : i32
    return %arg0, %arg1, %c0_i32, %c0_i32_0 : i32, i32, i32, i32
  }
  func.func @transform_1(%arg0: i32, %arg1: i32) -> (i32, i32) {
    %c0_i32 = arith.constant 0 : i32
    %c0_i32_0 = arith.constant 0 : i32
    %c0_i32_1 = arith.constant 0 : i32
    return %c0_i32, %c0_i32_0 : i32, i32
  }
  func.func @transform_2(%arg0: i32, %arg1: i32) -> (i32, i32) {
    %c0_i32 = arith.constant 0 : i32
    %c0_i32_0 = arith.constant 0 : i32
    %c0_i32_1 = arith.constant 0 : i32
    return %c0_i32, %c0_i32_0 : i32, i32
  }
  func.func @transform_3(%arg0: i32, %arg1: i32) -> (i32, i32, i32, i32) {
    %c0_i32 = arith.constant 0 : i32
    %c0_i32_0 = arith.constant 0 : i32
    %c0_i32_1 = arith.constant 0 : i32
    return %arg0, %arg1, %c0_i32, %c0_i32_0 : i32, i32, i32, i32
  }
}

</mosaic_0001>

<bundles_post_ra>
// kernel: depthwise_separable_conv.3
= control target key start
LH: loop header
LB: loop body
LE: loop exit
PB: predicated region body
PF: predicated region fallthrough
CT: control target
= control target key end

     0   :  { %s569_s12 = smov 0   ;;  %s571_s13 = smov 0   ;;  %s807_s0 = inlined_call_operand.vmem [shape: f32[2,16,16,8], index: 0, kind: input, shape index: {}, may-alias: {0,3}]   ;;  %s808_s1 = inlined_call_operand.vmem [shape: f32[1,8], index: 1, kind: input, shape index: {}]   ;;  %s809_s2 = inlined_call_operand.vmem [shape: f32[1,8], index: 2, kind: input, shape index: {}]   ;;  %s810_s3 = inlined_call_operand.vmem [shape: f32[2,16,16,8], index: 3, kind: output, shape index: {}, may-alias: {0,3}]  }
   0x1   :  { %s573_s14 = smov 0  }
   0x2 LB: > { %s25_s15 = sadd.s32 1, %s543_s13  ;;  %p490_p0 = scmp.ge.s32.totalorder %s547_s14, 1  ;;  %s547_s14 = sphi %s573_s14, %s13_s14   ;;  %s543_s13 = sphi %s571_s13, %s812_s13   ;;  %s539_s12 = sphi %s569_s12, %s811_s12  }
   0x3   : > { %p27_p1 = scmp.ge.s32.totalorder %s25_s15, 2  ;;  %p159_p2 = scmp.lt.s32.totalorder %s547_s14, 3 }
   0x5   : > { %s814_s15 = smov (%p27_p1, %s25_s15), 0  ;;  %p160_p3 = pnand %p490_p0, %p159_p2 }
   0x6   : > { %p194_p4 = scmp.lt.s32.totalorder (!%p160_p3), %s539_s12, 1  ;;  %v593_v0 = vld [vmem:[%s808_s1] ss:$0 sm:$0xff] (!%p160_p3)  ;;  %vm357_vm0 = vcmask (!%p160_p3), 64512  }
   0x7   : > { %163 = sbr.rel (%p160_p3) target bundleno = 47 (0x2f), region = 32  ;;  %v605_v1 = vld [vmem:[%s809_s2] ss:$0 sm:$0xff] (!%p160_p3) }
   0xe   : > { %s816_s12 = smov (!%p194_p4, %s539_s12), 1 }
   0xf   : > { %s499_s16 = sshll.u32 %s816_s12, 8 }
  0x10   : > { %s600_s21 = scalar_lea.vmem %s807_s0, %s499_s16  ;;  %s647_s26 = scalar_lea.vmem %s810_s3, %s499_s16 }
  0x11   : > { %v217_v2 = vld [vmem:[%s600_s21] sm:$0xff]  ;;  %v218_v3 = vld [vmem:[%s600_s21 + $0x8] sm:$0xff]  ;;  %v219_v4 = vld [vmem:[%s600_s21 + $0x10] sm:$0xff] }
  0x12   : > { %v220_v5 = vld [vmem:[%s600_s21 + $0x18] sm:$0xff]  ;;  %v221_v6 = vld [vmem:[%s600_s21 + $0x20] sm:$0xff]  ;;  %v222_v7 = vld [vmem:[%s600_s21 + $0x28] sm:$0xff]  ;;  %v255_v8 = vmul.f32 %v593_v0, %v217_v2  ;;  %v256_v9 = vmul.f32 %v593_v0, %v218_v3  ;;  %v257_v10 = vmul.f32 %v593_v0, %v219_v4 }
  0x13   : > { %v223_v11 = vld [vmem:[%s600_s21 + $0x30] sm:$0xff]  ;;  %v224_v12 = vld [vmem:[%s600_s21 + $0x38] sm:$0xff]  ;;  %v258_v13 = vmul.f32 %v593_v0, %v220_v5  ;;  %v259_v14 = vmul.f32 %v593_v0, %v221_v6  ;;  %v260_v15 = vmul.f32 %v593_v0, %v222_v7  ;;  %v225_v20 = vld [vmem:[%s600_s21 + $0x40] sm:$0xff] }
  0x14   : > { %v293_v16 = vadd.f32 %v605_v1, %v255_v8  ;;  %v294_v17 = vadd.f32 %v605_v1, %v256_v9  ;;  %v295_v18 = vadd.f32 %v605_v1, %v257_v10  ;;  %v261_v19 = vmul.f32 %v593_v0, %v223_v11  ;;  %v226_v21 = vld [vmem:[%s600_s21 + $0x48] sm:$0xff]  ;;  %v227_v22 = vld [vmem:[%s600_s21 + $0x50] sm:$0xff]  ;;  %v228_v27 = vld [vmem:[%s600_s21 + $0x58] sm:$0xff] }
  0x15   : > { %v296_v23 = vadd.f32 %v605_v1, %v258_v13  ;;  %v297_v24 = vadd.f32 %v605_v1, %v259_v14  ;;  %v298_v25 = vadd.f32 %v605_v1, %v260_v15  ;;  %v262_v26 = vmul.f32 %v593_v0, %v224_v12  ;;  %v229_v28 = vld [vmem:[%s600_s21 + $0x60] sm:$0xff]  ;;  %v230_v29 = vld [vmem:[%s600_s21 + $0x68] sm:$0xff]  ;;  %v231_v34 = vld [vmem:[%s600_s21 + $0x70] sm:$0xff] }
  0x16   : > { %v325_v30 = vmax.f32 %v293_v16, 0.0  ;;  %v326_v31 = vmax.f32 %v294_v17, 0.0  ;;  %v327_v32 = vmax.f32 %v295_v18, 0.0  ;;  %v299_v33 = vadd.f32 %v605_v1, %v261_v19  ;;  %v232_v39 = vld [vmem:[%s600_s21 + $0x78] sm:$0xff]  ;;  %v233_v44 = vld [vmem:[%s600_s21 + $0x80] sm:$0xff]  ;;  %v234_v45 = vld [vmem:[%s600_s21 + $0x88] sm:$0xff] }
  0x17   : > { %v328_v35 = vmax.f32 %v296_v23, 0.0  ;;  %v329_v36 = vmax.f32 %v297_v24, 0.0  ;;  %v330_v37 = vmax.f32 %v298_v25, 0.0  ;;  %v300_v38 = vadd.f32 %v605_v1, %v262_v26  ;;  %v235_v46 = vld [vmem:[%s600_s21 + $0x90] sm:$0xff]  ;;  %v236_v47 = vld [vmem:[%s600_s21 + $0x98] sm:$0xff]  ;;  %v237_v48 = vld [vmem:[%s600_s21 + $0xa0] sm:$0xff] }
  0x18   : > { %v331_v40 = vmax.f32 %v299_v33, 0.0  ;;  %v263_v41 = vmul.f32 %v593_v0, %v225_v20  ;;  %v264_v42 = vmul.f32 %v593_v0, %v226_v21  ;;  %v265_v43 = vmul.f32 %v593_v0, %v227_v22  ;;  %v238_v49 = vld [vmem:[%s600_s21 + $0xa8] sm:$0xff]  ;;  %v239_v50 = vld [vmem:[%s600_s21 + $0xb0] sm:$0xff]  ;;  %v240_v51 = vld [vmem:[%s600_s21 + $0xb8] sm:$0xff] }
  0x19   : > { %v658_v52 = vld [vmem:[%s600_s21 + $0xc0] sm:$0xff]  ;;  %v661_v53 = vld [vmem:[%s600_s21 + $0xc8] sm:$0xff]  ;;  %v332_v54 = vmax.f32 %v300_v38, 0.0  ;;  %v266_v55 = vmul.f32 %v593_v0, %v228_v27  ;;  %v267_v56 = vmul.f32 %v593_v0, %v229_v28  ;;  %v268_v57 = vmul.f32 %v593_v0, %v230_v29  ;;  %v667_v58 = vld [vmem:[%s600_s21 + $0xd0] sm:$0xff] }
  0x1a   : > { %v670_v59 = vld [vmem:[%s600_s21 + $0xd8] sm:$0xff]  ;;  %v673_v60 = vld [vmem:[%s600_s21 + $0xe0] sm:$0xff]  ;;  %v301_v61 = vadd.f32 %v605_v1, %v263_v41  ;;  %v302_v62 = vadd.f32 %v605_v1, %v264_v42  ;;  %v303_v63 = vadd.f32 %v605_v1, %v265_v43  ;;  %v269_v2 = vmul.f32 %v593_v0, %v231_v34  ;;  %v680_v3 = vld [vmem:[%s600_s21 + $0xe8] sm:$0xff] }
  0x1b   : > { %v683_v4 = vld [vmem:[%s600_s21 + $0xf0] sm:$0xff]  ;;  %v686_v5 = vld [vmem:[%s600_s21 + $0xf8] sm:$0xff]  ;;  %v304_v6 = vadd.f32 %v605_v1, %v266_v55  ;;  %v305_v7 = vadd.f32 %v605_v1, %v267_v56  ;;  %v306_v8 = vadd.f32 %v605_v1, %v268_v57  ;;  %v270_v9 = vmul.f32 %v593_v0, %v232_v39 }
  0x1c   : > { %358 = vst.msk [vmem:[%s647_s26] sm:$0xff] %vm357_vm0, %v325_v30  ;;  %359 = vst.msk [vmem:[%s647_s26 + $0x8] sm:$0xff] %vm357_vm0, %v326_v31  ;;  %v333_v10 = vmax.f32 %v301_v61, 0.0  ;;  %v334_v11 = vmax.f32 %v302_v62, 0.0  ;;  %v335_v12 = vmax.f32 %v303_v63, 0.0  ;;  %v307_v13 = vadd.f32 %v605_v1, %v269_v2 }
  0x1d   : > { %360 = vst.msk [vmem:[%s647_s26 + $0x10] sm:$0xff] %vm357_vm0, %v327_v32  ;;  %361 = vst.msk [vmem:[%s647_s26 + $0x18] sm:$0xff] %vm357_vm0, %v328_v35  ;;  %v336_v14 = vmax.f32 %v304_v6, 0.0  ;;  %v337_v15 = vmax.f32 %v305_v7, 0.0  ;;  %v338_v16 = vmax.f32 %v306_v8, 0.0  ;;  %v308_v17 = vadd.f32 %v605_v1, %v270_v9 }
  0x1e   : > { %362 = vst.msk [vmem:[%s647_s26 + $0x20] sm:$0xff] %vm357_vm0, %v329_v36  ;;  %363 = vst.msk [vmem:[%s647_s26 + $0x28] sm:$0xff] %vm357_vm0, %v330_v37  ;;  %v339_v18 = vmax.f32 %v307_v13, 0.0  ;;  %v271_v19 = vmul.f32 %v593_v0, %v233_v44  ;;  %v272_v20 = vmul.f32 %v593_v0, %v234_v45  ;;  %v273_v21 = vmul.f32 %v593_v0, %v235_v46 }
  0x1f   : > { %364 = vst.msk [vmem:[%s647_s26 + $0x30] sm:$0xff] %vm357_vm0, %v331_v40  ;;  %365 = vst.msk [vmem:[%s647_s26 + $0x38] sm:$0xff] %vm357_vm0, %v332_v54  ;;  %v340_v22 = vmax.f32 %v308_v17, 0.0  ;;  %v274_v23 = vmul.f32 %v593_v0, %v236_v47  ;;  %v275_v24 = vmul.f32 %v593_v0, %v237_v48  ;;  %v276_v25 = vmul.f32 %v593_v0, %v238_v49 }
  0x20   : > { %366 = vst.msk [vmem:[%s647_s26 + $0x40] sm:$0xff] %vm357_vm0, %v333_v10  ;;  %367 = vst.msk [vmem:[%s647_s26 + $0x48] sm:$0xff] %vm357_vm0, %v334_v11  ;;  %v309_v26 = vadd.f32 %v605_v1, %v271_v19  ;;  %v310_v27 = vadd.f32 %v605_v1, %v272_v20  ;;  %v311_v28 = vadd.f32 %v605_v1, %v273_v21 }
  0x21   : > { %368 = vst.msk [vmem:[%s647_s26 + $0x50] sm:$0xff] %vm357_vm0, %v335_v12  ;;  %369 = vst.msk [vmem:[%s647_s26 + $0x58] sm:$0xff] %vm357_vm0, %v336_v14  ;;  %v277_v29 = vmul.f32 %v593_v0, %v239_v50  ;;  %v312_v30 = vadd.f32 %v605_v1, %v274_v23  ;;  %v313_v31 = vadd.f32 %v605_v1, %v275_v24 }
  0x22   : > { %370 = vst.msk [vmem:[%s647_s26 + $0x60] sm:$0xff] %vm357_vm0, %v337_v15  ;;  %371 = vst.msk [vmem:[%s647_s26 + $0x68] sm:$0xff] %vm357_vm0, %v338_v16  ;;  %v314_v32 = vadd.f32 %v605_v1, %v276_v25  ;;  %v278_v33 = vmul.f32 %v593_v0, %v240_v51  ;;  %v341_v34 = vmax.f32 %v309_v26, 0.0  ;;  %v342_v35 = vmax.f32 %v310_v27, 0.0 }
  0x23   : > { %372 = vst.msk [vmem:[%s647_s26 + $0x70] sm:$0xff] %vm357_vm0, %v339_v18  ;;  %373 = vst.msk [vmem:[%s647_s26 + $0x78] sm:$0xff] %vm357_vm0, %v340_v22  ;;  %v343_v36 = vmax.f32 %v311_v28, 0.0  ;;  %v315_v37 = vadd.f32 %v605_v1, %v277_v29  ;;  %v344_v38 = vmax.f32 %v312_v30, 0.0  ;;  %v345_v39 = vmax.f32 %v313_v31, 0.0 }
  0x24   : > { %v346_v40 = vmax.f32 %v314_v32, 0.0  ;;  %v316_v41 = vadd.f32 %v605_v1, %v278_v33  ;;  %374 = vst.msk [vmem:[%s647_s26 + $0x80] sm:$0xff] %vm357_vm0, %v341_v34  ;;  %375 = vst.msk [vmem:[%s647_s26 + $0x88] sm:$0xff] %vm357_vm0, %v342_v35  ;;  %v279_v43 = vmul.f32 %v593_v0, %v658_v52  ;;  %v280_v44 = vmul.f32 %v593_v0, %v661_v53 }
  0x25   : > { %376 = vst.msk [vmem:[%s647_s26 + $0x90] sm:$0xff] %vm357_vm0, %v343_v36  ;;  %v347_v42 = vmax.f32 %v315_v37, 0.0  ;;  %v281_v45 = vmul.f32 %v593_v0, %v667_v58  ;;  %377 = vst.msk [vmem:[%s647_s26 + $0x98] sm:$0xff] %vm357_vm0, %v344_v38  ;;  %v282_v47 = vmul.f32 %v593_v0, %v670_v59  ;;  %v283_v48 = vmul.f32 %v593_v0, %v673_v60 }
  0x26   : > { %378 = vst.msk [vmem:[%s647_s26 + $0xa0] sm:$0xff] %vm357_vm0, %v345_v39  ;;  %379 = vst.msk [vmem:[%s647_s26 + $0xa8] sm:$0xff] %vm357_vm0, %v346_v40  ;;  %v348_v46 = vmax.f32 %v316_v41, 0.0  ;;  %v284_v49 = vmul.f32 %v593_v0, %v680_v3  ;;  %v317_v50 = vadd.f32 %v605_v1, %v279_v43  ;;  %v318_v51 = vadd.f32 %v605_v1, %v280_v44 }
  0x27   : > { %380 = vst.msk [vmem:[%s647_s26 + $0xb0] sm:$0xff] %vm357_vm0, %v347_v42  ;;  %v319_v52 = vadd.f32 %v605_v1, %v281_v45  ;;  %v285_v53 = vmul.f32 %v593_v0, %v683_v4  ;;  %v320_v54 = vadd.f32 %v605_v1, %v282_v47  ;;  %v321_v55 = vadd.f32 %v605_v1, %v283_v48 }
  0x28   : > { %381 = vst.msk [vmem:[%s647_s26 + $0xb8] sm:$0xff] %vm357_vm0, %v348_v46  ;;  %v322_v56 = vadd.f32 %v605_v1, %v284_v49  ;;  %v286_v57 = vmul.f32 %v593_v0, %v686_v5  ;;  %v349_v58 = vmax.f32 %v317_v50, 0.0  ;;  %v350_v59 = vmax.f32 %v318_v51, 0.0 }
  0x29   : > { %v351_v60 = vmax.f32 %v319_v52, 0.0  ;;  %v323_v61 = vadd.f32 %v605_v1, %v285_v53  ;;  %v352_v62 = vmax.f32 %v320_v54, 0.0  ;;  %v353_v63 = vmax.f32 %v321_v55, 0.0 }
  0x2a   : > { %v354_v2 = vmax.f32 %v322_v56, 0.0  ;;  %v324_v3 = vadd.f32 %v605_v1, %v286_v57  ;;  %382 = vst.msk [vmem:[%s647_s26 + $0xc0] sm:$0xff] %vm357_vm0, %v349_v58  ;;  %383 = vst.msk [vmem:[%s647_s26 + $0xc8] sm:$0xff] %vm357_vm0, %v350_v59 }
  0x2b   : > { %384 = vst.msk [vmem:[%s647_s26 + $0xd0] sm:$0xff] %vm357_vm0, %v351_v60  ;;  %v355_v4 = vmax.f32 %v323_v61, 0.0  ;;  %385 = vst.msk [vmem:[%s647_s26 + $0xd8] sm:$0xff] %vm357_vm0, %v352_v62 }
  0x2c   : > { %386 = vst.msk [vmem:[%s647_s26 + $0xe0] sm:$0xff] %vm357_vm0, %v353_v63  ;;  %387 = vst.msk [vmem:[%s647_s26 + $0xe8] sm:$0xff] %vm357_vm0, %v354_v2  ;;  %v356_v0 = vmax.f32 %v324_v3, 0.0 }
  0x2d   : > { %388 = vst.msk [vmem:[%s647_s26 + $0xf0] sm:$0xff] %vm357_vm0, %v355_v4 }
  0x2e   : > { %389 = vst.msk [vmem:[%s647_s26 + $0xf8] sm:$0xff] %vm357_vm0, %v356_v0 }
  0x2f PF: > { %s13_s14 = sadd.s32 1, %s547_s14   ;;  %s811_s12 = smov %s543_s13 }
  0x30   : > { %p10_p5 = scmp.ge.s32.totalorder %s13_s14, 4   ;;  %s812_s13 = smov %s814_s15 }
  0x32   :  { %12 = sbr.rel (!%p10_p5) target bundleno = 2 (0x2), region = 62 }

// kernel: depthwise_separable_conv.2
= control target key start
LH: loop header
LB: loop body
LE: loop exit
PB: predicated region body
PF: predicated region fallthrough
CT: control target
= control target key end

     0   :  { %s2949_s15 = smov 0   ;;  %s2951_s16 = smov 0   ;;  %s4369_s0 = inlined_call_operand.vmem [shape: f32[2,18,18,4], index: 0, kind: input, shape index: {}]   ;;  %s4370_s1 = inlined_call_operand.vmem [shape: f32[36,8], index: 1, kind: input, shape index: {}]   ;;  %s4371_s2 = inlined_call_operand.vmem [shape: f32[2,16,16,8], index: 2, kind: output, shape index: {0}]   ;;  %s4372_s3 = inlined_call_operand.vmem [shape: f32[2,1,8], index: 3, kind: output, shape index: {1}]   ;;  %s4373_s4 = inlined_call_operand.vmem [shape: f32[2,1,8], index: 4, kind: output, shape index: {2}]  }
   0x1   :  { %s2953_s17 = smov 0  }
   0x2 LB: > { %s27_s18 = sadd.s32 1, %s2910_s16  ;;  %p2518_p0 = scmp.ge.s32.totalorder %s2914_s17, 1  ;;  %s2914_s17 = sphi %s2953_s17, %s15_s17   ;;  %s2910_s16 = sphi %s2951_s16, %s4470_s16   ;;  %s2906_s15 = sphi %s2949_s15, %s4469_s15  }
   0x3   : > { %p29_p1 = scmp.ge.s32.totalorder %s27_s18, 2  ;;  %p189_p2 = scmp.lt.s32.totalorder %s2914_s17, 3 }
   0x5   : > { %s4472_s18 = smov (%p29_p1, %s27_s18), 0  ;;  %p190_p3 = pnand %p2518_p0, %p189_p2 }
   0x7   : > { %193 = sbr.rel (%p190_p3) target bundleno = 879 (0x36f), region = 28 }
   0xe   : > { %p230_p4 = scmp.lt.s32.totalorder %s2906_s15, 1  ;;  %s2916_s23 = smov 4   ;;  %vm1571_vm0 = vcmask 31744   ;;  %vm1937_vm1 = vcmask 1043456   ;;  %vm1604_vm2 = vcmask 64512   ;;  %vm1637_vm3 = vcmask 97280  }
   0xf   : > { %s2917_s24 = smov 8   ;;  %s2918_s25 = smov 12   ;;  %vm1670_vm4 = vcmask 130048   ;;  %vm1703_vm5 = vcmask 162816   ;;  %vm1736_vm6 = vcmask 195584   ;;  %vm1769_vm7 = vcmask 228352  }
  0x10   : > { %s4474_s15 = smov (!%p230_p4, %s2906_s15), 1  ;;  %s2919_s30 = smov 16   ;;  %vm1802_vm8 = vcmask 261120   ;;  %vm1840_vm9 = vcmask 293888   ;;  %vm2235_vm10 = vcmask 57344  }
  0x11   : > { %s2859_s19 = smul.u32 432, %s4474_s15  ;;  %s2920_s5 = smov 20  }
  0x12   : > { %s2921_s10 = smov 24   ;;  %s2922_s13 = smov 28  }
  0x13   : > { %s2973_s22 = scalar_lea.vmem %s4369_s0, %s2859_s19  ;;  %s2923_s14 = smov 32  }
  0x14   : > { %v2976_v0 = vld [vmem:[%s2973_s22 + $0x19] sm:$0xff]  ;;  %v289_v1 = vld [vmem:[%s2973_s22 + $0x1] sm:$0xff]  ;;  %v290_v3 = vld [vmem:[%s2973_s22 + $0x9] sm:$0xff]  ;;  %s2749_s19 = sshll.u32 %s4474_s15, 8  ;;  %s255_s28 = scalar_lea.vmem %s4373_s4, %s4474_s15 }
  0x15   : > { %583 = vrot.lane.b32.xlu1 %v2976_v0, %s2916_s23  ;;  %579 = vrot.lane.b32.xlu0 %v289_v1, %s2916_s23  ;;  %v2983_v2 = vld [vmem:[%s2973_s22 + $0x21] sm:$0xff]  ;;  %v2990_v4 = vld [vmem:[%s2973_s22 + $0x39] sm:$0xff] }
  0x16   : > { %v2993_v5 = vld [vmem:[%s2973_s22 + $0x31] sm:$0xff]  ;;  %v3003_v7 = vld [vmem:[%s2973_s22 + $0x49] sm:$0xff]  ;;  %v3013_v9 = vld [vmem:[%s2973_s22 + $0x61] sm:$0xff] }
  0x17   : > { %v3000_v6 = vld [vmem:[%s2973_s22 + $0x51] sm:$0xff]  ;;  %v3010_v8 = vld [vmem:[%s2973_s22 + $0x69] sm:$0xff]  ;;  %v3020_v10 = vld [vmem:[%s2973_s22 + $0x81] sm:$0xff] }
  0x18   : > { %v3023_v11 = vld [vmem:[%s2973_s22 + $0x79] sm:$0xff]  ;;  %v3033_v13 = vld [vmem:[%s2973_s22 + $0x91] sm:$0xff]  ;;  %v3043_v15 = vld [vmem:[%s2973_s22 + $0xa9] sm:$0xff] }
  0x19   : > { %585 = vrot.lane.b32.xlu1 %v2983_v2, %s2916_s23  ;;  %581 = vrot.lane.b32.xlu0 %v290_v3, %s2916_s23  ;;  %v3030_v12 = vld [vmem:[%s2973_s22 + $0x99] sm:$0xff]  ;;  %v3040_v14 = vld [vmem:[%s2973_s22 + $0xb1] sm:$0xff] }
  0x1a   : > { %v306_v16 = vld [vmem:[%s2973_s22 + $0xc9] sm:$0xff]  ;;  %v3051_v17 = vld [vmem:[%s2973_s22 + $0xc1] sm:$0xff]  ;;  %v307_v19 = vld [vmem:[%s2973_s22 + $0xd9] sm:$0xff] }
  0x1b   : > { %v308_v18 = vld [vmem:[%s2973_s22 + $0xe1] sm:$0xff]  ;;  %v310_v20 = vld [vmem:[%s2973_s22 + $0xf9] sm:$0xff]  ;;  %v309_v21 = vld [vmem:[%s2973_s22 + $0xf1] sm:$0xff] }
  0x1c   : > { %v312_v22 = vld [vmem:[%s2973_s22 + $0x111] sm:$0xff]  ;;  %v311_v23 = vld [vmem:[%s2973_s22 + $0x109] sm:$0xff]  ;;  %v313_v25 = vld [vmem:[%s2973_s22 + $0x121] sm:$0xff] }
  0x1d   : > { %589 = vrot.lane.b32.xlu1 %v2990_v4, %s2916_s23  ;;  %587 = vrot.lane.b32.xlu0 %v2993_v5, %s2916_s23  ;;  %v314_v24 = vld [vmem:[%s2973_s22 + $0x129] sm:$0xff]  ;;  %v316_v26 = vld [vmem:[%s2973_s22 + $0x141] sm:$0xff] }
  0x1e   : > { %v315_v27 = vld [vmem:[%s2973_s22 + $0x139] sm:$0xff]  ;;  %v317_v29 = vld [vmem:[%s2973_s22 + $0x151] sm:$0xff]  ;;  %v319_v31 = vld [vmem:[%s2973_s22 + $0x169] sm:$0xff] }
  0x1f   : > { %v318_v28 = vld [vmem:[%s2973_s22 + $0x159] sm:$0xff]  ;;  %v320_v30 = vld [vmem:[%s2973_s22 + $0x171] sm:$0xff]  ;;  %v321_v33 = vld [vmem:[%s2973_s22 + $0x2] sm:$0xff] }
  0x20   : > { %v322_v32 = vld [vmem:[%s2973_s22 + $0xa] sm:$0xff]  ;;  %v3089_v34 = vld [vmem:[%s2973_s22 + $0x22] sm:$0xff]  ;;  %v3092_v35 = vld [vmem:[%s2973_s22 + $0x1a] sm:$0xff] }
  0x21   : > { %593 = vrot.lane.b32.xlu1 %v3000_v6, %s2916_s23  ;;  %591 = vrot.lane.b32.xlu0 %v3003_v7, %s2916_s23  ;;  %v3099_v36 = vld [vmem:[%s2973_s22 + $0x3a] sm:$0xff]  ;;  %v3102_v37 = vld [vmem:[%s2973_s22 + $0x32] sm:$0xff] }
  0x22   : > { %v3109_v38 = vld [vmem:[%s2973_s22 + $0x52] sm:$0xff]  ;;  %v3112_v39 = vld [vmem:[%s2973_s22 + $0x4a] sm:$0xff]  ;;  %v3122_v41 = vld [vmem:[%s2973_s22 + $0x62] sm:$0xff] }
  0x23   : > { %v3119_v40 = vld [vmem:[%s2973_s22 + $0x6a] sm:$0xff]  ;;  %v3129_v42 = vld [vmem:[%s2973_s22 + $0x82] sm:$0xff]  ;;  %v3132_v43 = vld [vmem:[%s2973_s22 + $0x7a] sm:$0xff] }
  0x24   : > { %v3139_v44 = vld [vmem:[%s2973_s22 + $0x9a] sm:$0xff]  ;;  %v3142_v45 = vld [vmem:[%s2973_s22 + $0x92] sm:$0xff]  ;;  %v3152_v47 = vld [vmem:[%s2973_s22 + $0xaa] sm:$0xff] }
  0x25   : > { %597 = vrot.lane.b32.xlu1 %v3010_v8, %s2916_s23  ;;  %595 = vrot.lane.b32.xlu0 %v3013_v9, %s2916_s23  ;;  %v3149_v46 = vld [vmem:[%s2973_s22 + $0xb2] sm:$0xff]  ;;  %v3159_v48 = vld [vmem:[%s2973_s22 + $0xca] sm:$0xff] }
  0x26   : > { %v3162_v49 = vld [vmem:[%s2973_s22 + $0xc2] sm:$0xff]  ;;  %v3172_v51 = vld [vmem:[%s2973_s22 + $0xda] sm:$0xff]  ;;  %v341_v53 = vld [vmem:[%s2973_s22 + $0xf2] sm:$0xff] }
  0x27   : > { %v3169_v50 = vld [vmem:[%s2973_s22 + $0xe2] sm:$0xff]  ;;  %v342_v52 = vld [vmem:[%s2973_s22 + $0xfa] sm:$0xff]  ;;  %v344_v54 = vld [vmem:[%s2973_s22 + $0x112] sm:$0xff] }
  0x28   : > { %v343_v55 = vld [vmem:[%s2973_s22 + $0x10a] sm:$0xff]  ;;  %v345_v57 = vld [vmem:[%s2973_s22 + $0x122] sm:$0xff]  ;;  %v347_v59 = vld [vmem:[%s2973_s22 + $0x13a] sm:$0xff] }
  0x29   : > { %601 = vrot.lane.b32.xlu1 %v3020_v10, %s2916_s23  ;;  %599 = vrot.lane.b32.xlu0 %v3023_v11, %s2916_s23  ;;  %v346_v56 = vld [vmem:[%s2973_s22 + $0x12a] sm:$0xff]  ;;  %v348_v58 = vld [vmem:[%s2973_s22 + $0x142] sm:$0xff] }
  0x2a   : > { %v350_v62 = vld [vmem:[%s2973_s22 + $0x15a] sm:$0xff]  ;;  %v349_v63 = vld [vmem:[%s2973_s22 + $0x152] sm:$0xff] }
  0x2d   : > { %605 = vrot.lane.b32.xlu1 %v3030_v12, %s2916_s23  ;;  %603 = vrot.lane.b32.xlu0 %v3033_v13, %s2916_s23 }
  0x31   : > { %609 = vrot.lane.b32.xlu1 %v3040_v14, %s2916_s23  ;;  %607 = vrot.lane.b32.xlu0 %v3043_v15, %s2916_s23 }
  0x35   : > { %613 = vrot.lane.b32.xlu1 %v306_v16, %s2916_s23  ;;  %611 = vrot.lane.b32.xlu0 %v3051_v17, %s2916_s23  ;;  %v352_v16 = vld [vmem:[%s2973_s22 + $0x172] sm:$0xff] }
  0x39   : > { %617 = vrot.lane.b32.xlu1 %v308_v18, %s2916_s23  ;;  %615 = vrot.lane.b32.xlu0 %v307_v19, %s2916_s23  ;;  %v351_v18 = vld [vmem:[%s2973_s22 + $0x16a] sm:$0xff] }
  0x3d   : > { %621 = vrot.lane.b32.xlu1 %v310_v20, %s2916_s23  ;;  %619 = vrot.lane.b32.xlu0 %v309_v21, %s2916_s23  ;;  %v3215_v21 = vld [vmem:[%s2973_s22 + $0x50] sm:$0xff] }
  0x41   : > { %625 = vrot.lane.b32.xlu1 %v312_v22, %s2916_s23  ;;  %623 = vrot.lane.b32.xlu0 %v311_v23, %s2916_s23 }
  0x45   : > { %629 = vrot.lane.b32.xlu1 %v314_v24, %s2916_s23  ;;  %627 = vrot.lane.b32.xlu0 %v313_v25, %s2916_s23  ;;  %v3220_v24 = vld [vmem:[%s2973_s22 + $0x18] sm:$0xff]  ;;  %v3223_v25 = vld [vmem:[%s2973_s22 + $0x20] sm:$0xff] }
  0x49   : > { %633 = vrot.lane.b32.xlu1 %v316_v26, %s2916_s23  ;;  %631 = vrot.lane.b32.xlu0 %v315_v27, %s2916_s23 }
  0x4d   : > { %637 = vrot.lane.b32.xlu1 %v318_v28, %s2916_s23  ;;  %635 = vrot.lane.b32.xlu0 %v317_v29, %s2916_s23  ;;  %v3238_v29 = vld [vmem:[%s2973_s22 + $0x38] sm:$0xff] }
  0x51   : > { %641 = vrot.lane.b32.xlu1 %v320_v30, %s2916_s23  ;;  %639 = vrot.lane.b32.xlu0 %v319_v31, %s2916_s23  ;;  %v3241_v30 = vld [vmem:[%s2973_s22 + $0x30] sm:$0xff]  ;;  %s4071_s23 = scalar_lea.vmem %s4371_s2, %s2749_s19 }
  0x55   : > { %709 = vrot.lane.b32.xlu1 %v322_v32, %s2917_s24  ;;  %707 = vrot.lane.b32.xlu0 %v321_v33, %s2917_s24  ;;  %v3252_v33 = vld [vmem:[%s2973_s22 + $0x48] sm:$0xff] }
  0x59   : > { %713 = vrot.lane.b32.xlu1 %v3089_v34, %s2917_s24  ;;  %711 = vrot.lane.b32.xlu0 %v3092_v35, %s2917_s24 }
  0x5d   : > { %717 = vrot.lane.b32.xlu1 %v3099_v36, %s2917_s24  ;;  %715 = vrot.lane.b32.xlu0 %v3102_v37, %s2917_s24 }
  0x61   : > { %721 = vrot.lane.b32.xlu1 %v3109_v38, %s2917_s24  ;;  %719 = vrot.lane.b32.xlu0 %v3112_v39, %s2917_s24 }
  0x65   : > { %725 = vrot.lane.b32.xlu1 %v3119_v40, %s2917_s24  ;;  %723 = vrot.lane.b32.xlu0 %v3122_v41, %s2917_s24 }
  0x69   : > { %729 = vrot.lane.b32.xlu1 %v3129_v42, %s2917_s24  ;;  %727 = vrot.lane.b32.xlu0 %v3132_v43, %s2917_s24 }
  0x6d   : > { %733 = vrot.lane.b32.xlu1 %v3139_v44, %s2917_s24  ;;  %731 = vrot.lane.b32.xlu0 %v3142_v45, %s2917_s24 }
  0x71   : > { %737 = vrot.lane.b32.xlu1 %v3149_v46, %s2917_s24  ;;  %735 = vrot.lane.b32.xlu0 %v3152_v47, %s2917_s24 }
  0x75   : > { %741 = vrot.lane.b32.xlu1 %v3159_v48, %s2917_s24  ;;  %739 = vrot.lane.b32.xlu0 %v3162_v49, %s2917_s24 }
  0x79   : > { %745 = vrot.lane.b32.xlu1 %v3169_v50, %s2917_s24  ;;  %743 = vrot.lane.b32.xlu0 %v3172_v51, %s2917_s24 }
  0x7d   : > { %749 = vrot.lane.b32.xlu1 %v342_v52, %s2917_s24  ;;  %747 = vrot.lane.b32.xlu0 %v341_v53, %s2917_s24 }
  0x81   : > { %753 = vrot.lane.b32.xlu1 %v344_v54, %s2917_s24  ;;  %751 = vrot.lane.b32.xlu0 %v343_v55, %s2917_s24  ;;  %v3263_v54 = vld [vmem:[%s2973_s22 + $0x68] sm:$0xff]  ;;  %v3266_v55 = vld [vmem:[%s2973_s22 + $0x60] sm:$0xff] }
  0x85   : > { %757 = vrot.lane.b32.xlu1 %v346_v56, %s2917_s24  ;;  %755 = vrot.lane.b32.xlu0 %v345_v57, %s2917_s24 }
  0x87   : > { %v3192_v60 = vpop.permute.xlu1 %583  ;;  %v3194_v61 = vpop.permute.xlu0 %579 }
  0x89   : > { %761 = vrot.lane.b32.xlu1 %v348_v58, %s2917_s24  ;;  %759 = vrot.lane.b32.xlu0 %v347_v59, %s2917_s24  ;;  %v3277_v58 = vld [vmem:[%s2973_s22 + $0x80] sm:$0xff]  ;;  %v3280_v59 = vld [vmem:[%s2973_s22 + $0x78] sm:$0xff] }
  0x8b   : > { %v3200_v1 = vpop.permute.xlu1 %585  ;;  %v3202_v3 = vpop.permute.xlu0 %581 }
  0x8d   : > { %765 = vrot.lane.b32.xlu1 %v350_v62, %s2917_s24  ;;  %763 = vrot.lane.b32.xlu0 %v349_v63, %s2917_s24 }
  0x8f   : > { %v3208_v19 = vpop.permute.xlu1 %589  ;;  %v3210_v20 = vpop.permute.xlu0 %587 }
  0x91   : > { %769 = vrot.lane.b32.xlu1 %v352_v16, %s2917_s24  ;;  %767 = vrot.lane.b32.xlu0 %v351_v18, %s2917_s24  ;;  %v3291_v16 = vld [vmem:[%s2973_s22 + $0x98] sm:$0xff]  ;;  %v3294_v18 = vld [vmem:[%s2973_s22 + $0x90] sm:$0xff] }
  0x92   : > { %4384 = vst [vmem:[#allocation9_spill] sm:$0xff] %v3291_v16 }
  0x93   : > { %v594_v22 = vpop.permute.xlu1 %593  ;;  %v3217_v23 = vpop.permute.xlu0 %591 }
  0x94   : > { %v3227_v26 = vsel %vm1571_vm0, %v3215_v21, %v594_v22 }
  0x95   : > { %837 = vrot.lane.b32.xlu1 %v3223_v25, %s2918_s25  ;;  %835 = vrot.lane.b32.xlu0 %v3220_v24, %s2918_s25 }
  0x97   : > { %v3233_v27 = vpop.permute.xlu1 %597  ;;  %v3235_v28 = vpop.permute.xlu0 %595 }
  0x99   : > { %841 = vrot.lane.b32.xlu1 %v3238_v29, %s2918_s25  ;;  %839 = vrot.lane.b32.xlu0 %v3241_v30, %s2918_s25 }
  0x9b   : > { %v3247_v31 = vpop.permute.xlu1 %601  ;;  %v3249_v32 = vpop.permute.xlu0 %599 }
  0x9c   : > { %4377 = vst [vmem:[#allocation2_spill] sm:$0xff] %v3247_v31 }
  0x9d   : > { %845 = vrot.lane.b32.xlu1 %v3215_v21, %s2918_s25  ;;  %843 = vrot.lane.b32.xlu0 %v3252_v33, %s2918_s25 }
  0x9f   : > { %v3258_v52 = vpop.permute.xlu1 %605  ;;  %v3260_v53 = vpop.permute.xlu0 %603 }
  0xa0   : > { %4378 = vst [vmem:[#allocation3_spill] sm:$0xff] %v3258_v52  ;;  %4379 = vst [vmem:[#allocation4_spill] sm:$0xff] %v3260_v53  ;;  %v3308_v52 = vld [vmem:[%s2973_s22 + $0xa8] sm:$0xff] }
  0xa1   : > { %849 = vrot.lane.b32.xlu1 %v3263_v54, %s2918_s25  ;;  %847 = vrot.lane.b32.xlu0 %v3266_v55, %s2918_s25  ;;  %4388 = vst [vmem:[#allocation13_spill] sm:$0xff] %v3308_v52 }
  0xa3   : > { %v3272_v56 = vpop.permute.xlu1 %609  ;;  %v3274_v57 = vpop.permute.xlu0 %607 }
  0xa4   : > { %4380 = vst [vmem:[#allocation5_spill] sm:$0xff] %v3272_v56  ;;  %4381 = vst [vmem:[#allocation6_spill] sm:$0xff] %v3274_v57  ;;  %v3305_v57 = vld [vmem:[%s2973_s22 + $0xb0] sm:$0xff] }
  0xa5   : > { %853 = vrot.lane.b32.xlu1 %v3277_v58, %s2918_s25  ;;  %851 = vrot.lane.b32.xlu0 %v3280_v59, %s2918_s25  ;;  %4387 = vst [vmem:[#allocation12_spill] sm:$0xff] %v3305_v57 }
  0xa7   : > { %v3286_v62 = vpop.permute.xlu1 %613  ;;  %v3288_v63 = vpop.permute.xlu0 %611 }
  0xa8   : > { %4382 = vst [vmem:[#allocation7_spill] sm:$0xff] %v3286_v62  ;;  %4383 = vst [vmem:[#allocation8_spill] sm:$0xff] %v3288_v63 }
  0xa9   : > { %857 = vrot.lane.b32.xlu1 %v3291_v16, %s2918_s25  ;;  %855 = vrot.lane.b32.xlu0 %v3294_v18, %s2918_s25 }
  0xab   : > { %v3300_v22 = vpop.permute.xlu1 %617  ;;  %v3302_v56 = vpop.permute.xlu0 %615 }
  0xac   : > { %4385 = vst [vmem:[#allocation10_spill] sm:$0xff] %v3300_v22  ;;  %4386 = vst [vmem:[#allocation11_spill] sm:$0xff] %v3302_v56  ;;  %v1835_v22 = vld [vmem:[%s4370_s1] sm:$0xff]  ;;  %v1836_v56 = vld [vmem:[%s4370_s1 + $0x8] sm:$0xff] }
  0xad   : > { %861 = vrot.lane.b32.xlu1 %v3305_v57, %s2918_s25  ;;  %859 = vrot.lane.b32.xlu0 %v3308_v52, %s2918_s25  ;;  %v2845_v53 = vpack.c.bf16 %v1836_v56, %v1835_v22 }
  0xaf   : > { %v3314_v62 = vpop.permute.xlu1 %621  ;;  %v3316_v63 = vpop.permute.xlu0 %619  ;;  %2846 = vmatprep.subr.bf16.mxu0 %v2845_v53  ;;  %2853 = vmatprep.subr.bf16.mxu1 %v2845_v53 }
  0xb0   : > { %4389 = vst [vmem:[#allocation14_spill] sm:$0xff] %v3314_v62  ;;  %4390 = vst [vmem:[#allocation15_spill] sm:$0xff] %v3316_v63  ;;  %2848 = vmatpush3.bf16.msra.mxu0 %v2845_v53  ;;  %2856 = vmatpush3.bf16.msra.mxu1 %v2845_v53 }
  0xb1   : > { %965 = vrot.lane.b32.xlu1 %v2983_v2, %s2919_s30  ;;  %963 = vrot.lane.b32.xlu0 %v2976_v0, %s2919_s30  ;;  %v1837_v0 = vld [vmem:[%s4370_s1 + $0x10] sm:$0xff]  ;;  %v1838_v2 = vld [vmem:[%s4370_s1 + $0x18] sm:$0xff] }
  0xb2   : > { %v2849_v56 = vpack.c.bf16 %v1838_v2, %v1837_v0 }
  0xb3   : > { %v3328_v31 = vpop.permute.xlu1 %625  ;;  %v3330_v62 = vpop.permute.xlu0 %623 }
  0xb4   : > { %4391 = vst [vmem:[#allocation16_spill] sm:$0xff] %v3328_v31  ;;  %4392 = vst [vmem:[#allocation17_spill] sm:$0xff] %v3330_v62  ;;  %2850 = vmatprep.subr.bf16.mxu0 %v2849_v56  ;;  %2854 = vmatprep.subr.bf16.mxu1 %v2849_v56 }
  0xb5   : > { %1093 = vrot.lane.b32.xlu1 %v3089_v34, %s2920_s5  ;;  %1091 = vrot.lane.b32.xlu0 %v3092_v35, %s2920_s5  ;;  %v1839_v34 = vld [vmem:[%s4370_s1 + $0x20] sm:$0xf] }
  0xb6   : > { %2852 = vmatpush3.bf16.msra.mxu0 %v2849_v56  ;;  %2857 = vmatpush3.bf16.msra.mxu1 %v2849_v56 }
  0xb7   : > { %v3342_v22 = vpop.permute.xlu1 %629  ;;  %v3344_v31 = vpop.permute.xlu0 %627  ;;  %2795 = vmatprep.subr.msk.mxu0 %vm1937_vm1, %v1839_v34  ;;  %2855 = vmatprep.subr.msk.mxu1 %vm1937_vm1, %v1839_v34 }
  0xb8   : > { %4393 = vst [vmem:[#allocation18_spill] sm:$0xff] %v3342_v22  ;;  %4394 = vst [vmem:[#allocation19_spill] sm:$0xff] %v3344_v31 }
  0xb9   : > { %1221 = vrot.lane.b32.xlu1 %v3238_v29, %s2921_s10  ;;  %1219 = vrot.lane.b32.xlu0 %v3241_v30, %s2921_s10 }
  0xba   : > { %2796 = vmatpush3.msk.msra.mxu0 %vm1937_vm1, %v1839_v34  ;;  %2858 = vmatpush3.msk.msra.mxu1 %vm1937_vm1, %v1839_v34 }
  0xbb   : > { %v3353_v35 = vpop.permute.xlu1 %633  ;;  %v3355_v53 = vpop.permute.xlu0 %631 }
  0xbc   : > { %4395 = vst [vmem:[#allocation20_spill] sm:$0xff] %v3353_v35  ;;  %4396 = vst [vmem:[#allocation21_spill] sm:$0xff] %v3355_v53 }
  0xbd   : > { %967 = vrot.lane.b32.xlu1 %v2993_v5, %s2919_s30  ;;  %1347 = vrot.lane.b32.xlu0 %v2993_v5, %s2922_s13 }
  0xbf   : > { %v3361_v0 = vpop.permute.xlu1 %637  ;;  %v3363_v2 = vpop.permute.xlu0 %635 }
  0xc0   : > { %4397 = vst [vmem:[#allocation22_spill] sm:$0xff] %v3361_v0  ;;  %4398 = vst [vmem:[#allocation23_spill] sm:$0xff] %v3363_v2 }
  0xc1   : > { %1475 = vrot.lane.b32.xlu1 %v3102_v37, %s2923_s14  ;;  %1349 = vrot.lane.b32.xlu0 %v2990_v4, %s2922_s13 }
  0xc3   : > { %v3369_v56 = vpop.permute.xlu1 %641  ;;  %v3371_v35 = vpop.permute.xlu0 %639 }
  0xc4   : > { %4399 = vst [vmem:[#allocation24_spill] sm:$0xff] %v3369_v56  ;;  %4400 = vst [vmem:[#allocation25_spill] sm:$0xff] %v3371_v35 }
  0xc5   : > { %1095 = vrot.lane.b32.xlu1 %v3102_v37, %s2920_s5  ;;  %969 = vrot.lane.b32.xlu0 %v2990_v4, %s2919_s30 }
  0xc7   : > { %v3377_v5 = vpop.permute.xlu1 %709  ;;  %v3379_v34 = vpop.permute.xlu0 %707 }
  0xc9   : > { %1097 = vrot.lane.b32.xlu1 %v3099_v36, %s2920_s5  ;;  %1477 = vrot.lane.b32.xlu0 %v3099_v36, %s2923_s14 }
  0xcb   : > { %v3385_v0 = vpop.permute.xlu1 %713  ;;  %v3387_v56 = vpop.permute.xlu0 %711 }
  0xcd   : > { %1225 = vrot.lane.b32.xlu1 %v3215_v21, %s2921_s10  ;;  %1223 = vrot.lane.b32.xlu0 %v3252_v33, %s2921_s10 }
  0xcf   : > { %v3393_v4 = vpop.permute.xlu1 %717  ;;  %v3395_v37 = vpop.permute.xlu0 %715 }
  0xd1   : > { %971 = vrot.lane.b32.xlu1 %v3003_v7, %s2919_s30  ;;  %1351 = vrot.lane.b32.xlu0 %v3003_v7, %s2922_s13 }
  0xd3   : > { %v3401_v36 = vpop.permute.xlu1 %721  ;;  %v3403_v35 = vpop.permute.xlu0 %719 }
  0xd5   : > { %1479 = vrot.lane.b32.xlu1 %v3112_v39, %s2923_s14  ;;  %1353 = vrot.lane.b32.xlu0 %v3000_v6, %s2922_s13 }
  0xd7   : > { %v3409_v21 = vpop.permute.xlu1 %725  ;;  %v3411_v2 = vpop.permute.xlu0 %723 }
  0xd9   : > { %1099 = vrot.lane.b32.xlu1 %v3112_v39, %s2920_s5  ;;  %973 = vrot.lane.b32.xlu0 %v3000_v6, %s2919_s30 }
  0xdb   : > { %v3417_v7 = vpop.permute.xlu1 %729  ;;  %v3419_v53 = vpop.permute.xlu0 %727 }
  0xdd   : > { %1101 = vrot.lane.b32.xlu1 %v3109_v38, %s2920_s5  ;;  %1481 = vrot.lane.b32.xlu0 %v3109_v38, %s2923_s14 }
  0xdf   : > { %v3425_v22 = vpop.permute.xlu1 %733  ;;  %v3427_v31 = vpop.permute.xlu0 %731 }
  0xe0   : > { %4401 = vst [vmem:[#allocation26_spill] sm:$0xff] %v3425_v22  ;;  %4402 = vst [vmem:[#allocation27_spill] sm:$0xff] %v3427_v31  ;;  %v3578_v31 = vld [vmem:[%s2973_s22 + $0xc0] sm:$0xff] }
  0xe1   : > { %1229 = vrot.lane.b32.xlu1 %v3263_v54, %s2921_s10  ;;  %1227 = vrot.lane.b32.xlu0 %v3266_v55, %s2921_s10 }
  0xe3   : > { %v3433_v6 = vpop.permute.xlu1 %737  ;;  %v3435_v39 = vpop.permute.xlu0 %735 }
  0xe4   : > { %4403 = vst [vmem:[#allocation28_spill] sm:$0xff] %v3433_v6  ;;  %4404 = vst [vmem:[#allocation29_spill] sm:$0xff] %v3435_v39 }
  0xe5   : > { %975 = vrot.lane.b32.xlu1 %v3013_v9, %s2919_s30  ;;  %1355 = vrot.lane.b32.xlu0 %v3013_v9, %s2922_s13 }
  0xe7   : > { %v3441_v38 = vpop.permute.xlu1 %741  ;;  %v3443_v62 = vpop.permute.xlu0 %739 }
  0xe8   : > { %4405 = vst [vmem:[#allocation30_spill] sm:$0xff] %v3441_v38  ;;  %4406 = vst [vmem:[#allocation31_spill] sm:$0xff] %v3443_v62 }
  0xe9   : > { %1483 = vrot.lane.b32.xlu1 %v3122_v41, %s2923_s14  ;;  %1357 = vrot.lane.b32.xlu0 %v3010_v8, %s2922_s13 }
  0xeb   : > { %v3449_v63 = vpop.permute.xlu1 %745  ;;  %v3451_v6 = vpop.permute.xlu0 %743 }
  0xec   : > { %4407 = vst [vmem:[#allocation32_spill] sm:$0xff] %v3449_v63  ;;  %4408 = vst [vmem:[#allocation33_spill] sm:$0xff] %v3451_v6 }
  0xed   : > { %1103 = vrot.lane.b32.xlu1 %v3122_v41, %s2920_s5  ;;  %977 = vrot.lane.b32.xlu0 %v3010_v8, %s2919_s30 }
  0xef   : > { %v3457_v9 = vpop.permute.xlu1 %749  ;;  %v3459_v38 = vpop.permute.xlu0 %747 }
  0xf0   : > { %4409 = vst [vmem:[#allocation34_spill] sm:$0xff] %v3457_v9  ;;  %4410 = vst [vmem:[#allocation35_spill] sm:$0xff] %v3459_v38 }
  0xf1   : > { %1105 = vrot.lane.b32.xlu1 %v3119_v40, %s2920_s5  ;;  %1485 = vrot.lane.b32.xlu0 %v3119_v40, %s2923_s14 }
  0xf3   : > { %v3465_v62 = vpop.permute.xlu1 %753  ;;  %v3467_v63 = vpop.permute.xlu0 %751 }
  0xf4   : > { %4411 = vst [vmem:[#allocation36_spill] sm:$0xff] %v3465_v62  ;;  %4412 = vst [vmem:[#allocation37_spill] sm:$0xff] %v3467_v63 }
  0xf5   : > { %1233 = vrot.lane.b32.xlu1 %v3277_v58, %s2921_s10  ;;  %1231 = vrot.lane.b32.xlu0 %v3280_v59, %s2921_s10 }
  0xf7   : > { %v3473_v8 = vpop.permute.xlu1 %757  ;;  %v3475_v41 = vpop.permute.xlu0 %755 }
  0xf8   : > { %4413 = vst [vmem:[#allocation38_spill] sm:$0xff] %v3473_v8  ;;  %4414 = vst [vmem:[#allocation39_spill] sm:$0xff] %v3475_v41 }
  0xf9   : > { %979 = vrot.lane.b32.xlu1 %v3023_v11, %s2919_s30  ;;  %1359 = vrot.lane.b32.xlu0 %v3023_v11, %s2922_s13 }
  0xfb   : > { %v3481_v40 = vpop.permute.xlu1 %761  ;;  %v3483_v62 = vpop.permute.xlu0 %759 }
  0xfc   : > { %4415 = vst [vmem:[#allocation40_spill] sm:$0xff] %v3481_v40  ;;  %4416 = vst [vmem:[#allocation41_spill] sm:$0xff] %v3483_v62 }
  0xfd   : > { %1487 = vrot.lane.b32.xlu1 %v3132_v43, %s2923_s14  ;;  %1361 = vrot.lane.b32.xlu0 %v3020_v10, %s2922_s13 }
  0xff   : > { %v3489_v63 = vpop.permute.xlu1 %765  ;;  %v3491_v8 = vpop.permute.xlu0 %763 }
 0x100   : > { %4417 = vst [vmem:[#allocation42_spill] sm:$0xff] %v3489_v63  ;;  %4418 = vst [vmem:[#allocation43_spill] sm:$0xff] %v3491_v8 }
 0x101   : > { %1107 = vrot.lane.b32.xlu1 %v3132_v43, %s2920_s5  ;;  %981 = vrot.lane.b32.xlu0 %v3020_v10, %s2919_s30 }
 0x103   : > { %v3497_v11 = vpop.permute.xlu1 %769  ;;  %v3499_v40 = vpop.permute.xlu0 %767 }
 0x104   : > { %4419 = vst [vmem:[#allocation44_spill] sm:$0xff] %v3497_v11  ;;  %4420 = vst [vmem:[#allocation45_spill] sm:$0xff] %v3499_v40 }
 0x105   : > { %1109 = vrot.lane.b32.xlu1 %v3129_v42, %s2920_s5  ;;  %1489 = vrot.lane.b32.xlu0 %v3129_v42, %s2923_s14 }
 0x107   : > { %v3505_v62 = vpop.permute.xlu1 %837  ;;  %v836_v63 = vpop.permute.xlu0 %835 }
 0x109   : > { %1237 = vrot.lane.b32.xlu1 %v3291_v16, %s2921_s10  ;;  %1235 = vrot.lane.b32.xlu0 %v3294_v18, %s2921_s10 }
 0x10b   : > { %v3511_v10 = vpop.permute.xlu1 %841  ;;  %v3513_v43 = vpop.permute.xlu0 %839 }
 0x10d   : > { %983 = vrot.lane.b32.xlu1 %v3033_v13, %s2919_s30  ;;  %1363 = vrot.lane.b32.xlu0 %v3033_v13, %s2922_s13 }
 0x10f   : > { %v3519_v42 = vpop.permute.xlu1 %845  ;;  %v3521_v40 = vpop.permute.xlu0 %843 }
 0x111   : > { %1491 = vrot.lane.b32.xlu1 %v3142_v45, %s2923_s14  ;;  %1365 = vrot.lane.b32.xlu0 %v3030_v12, %s2922_s13 }
 0x113   : > { %v3527_v11 = vpop.permute.xlu1 %849  ;;  %v3529_v8 = vpop.permute.xlu0 %847 }
 0x115   : > { %1111 = vrot.lane.b32.xlu1 %v3142_v45, %s2920_s5  ;;  %985 = vrot.lane.b32.xlu0 %v3030_v12, %s2919_s30 }
 0x117   : > { %v3535_v13 = vpop.permute.xlu1 %853  ;;  %v3537_v41 = vpop.permute.xlu0 %851 }
 0x119   : > { %1113 = vrot.lane.b32.xlu1 %v3139_v44, %s2920_s5  ;;  %1493 = vrot.lane.b32.xlu0 %v3139_v44, %s2923_s14 }
 0x11b   : > { %v3543_v9 = vpop.permute.xlu1 %857  ;;  %v3545_v38 = vpop.permute.xlu0 %855 }
 0x11d   : > { %1241 = vrot.lane.b32.xlu1 %v3305_v57, %s2921_s10  ;;  %1239 = vrot.lane.b32.xlu0 %v3308_v52, %s2921_s10  ;;  %v257_v52 = vld [vmem:[%s2973_s22] sm:$0xff] }
 0x11e   : > { %v1572_v22 = vsel %vm1571_vm0, %v257_v52, %v3194_v61 }
 0x11f   : > { %v3551_v12 = vpop.permute.xlu1 %861  ;;  %v3553_v45 = vpop.permute.xlu0 %859 }
 0x120   : > { %4421 = vst [vmem:[#allocation46_spill] sm:$0xff] %v3551_v12  ;;  %4422 = vst [vmem:[#allocation47_spill] sm:$0xff] %v3553_v45 }
 0x121   : > { %987 = vrot.lane.b32.xlu1 %v3043_v15, %s2919_s30  ;;  %1367 = vrot.lane.b32.xlu0 %v3043_v15, %s2922_s13 }
 0x123   : > { %v966_v44 = vpop.permute.xlu1 %965  ;;  %v964_v6 = vpop.permute.xlu0 %963 }
 0x125   : > { %1495 = vrot.lane.b32.xlu1 %v3152_v47, %s2923_s14  ;;  %1369 = vrot.lane.b32.xlu0 %v3040_v14, %s2922_s13 }
 0x127   : > { %v1094_v57 = vpop.permute.xlu1 %1093  ;;  %v1092_v39 = vpop.permute.xlu0 %1091 }
 0x129   : > { %1115 = vrot.lane.b32.xlu1 %v3152_v47, %s2920_s5  ;;  %989 = vrot.lane.b32.xlu0 %v3040_v14, %s2919_s30  ;;  %v1605_v14 = vsel %vm1604_vm2, %v1572_v22, %v3379_v34 }
 0x12a   : > { %v1638_v47 = vsel %vm1637_vm3, %v1605_v14, %v836_v63 }
 0x12b   : > { %v1222_v15 = vpop.permute.xlu1 %1221  ;;  %v1220_v12 = vpop.permute.xlu0 %1219  ;;  %v1671_v61 = vsel %vm1670_vm4, %v1638_v47, %v964_v6  ;;  %v3590_v6 = vld [vmem:[%s2973_s22 + $0xc8] sm:$0xff] }
 0x12c   : > { %v1704_v52 = vsel %vm1703_vm5, %v1671_v61, %v1092_v39 }
 0x12d   : > { %1117 = vrot.lane.b32.xlu1 %v3149_v46, %s2920_s5  ;;  %1497 = vrot.lane.b32.xlu0 %v3149_v46, %s2923_s14  ;;  %v258_v46 = vld [vmem:[%s2973_s22 + $0x8] sm:$0xff]  ;;  %v1737_v63 = vsel %vm1736_vm6, %v1704_v52, %v1220_v12 }
 0x12e   : > { %v1573_v47 = vsel %vm1571_vm0, %v258_v46, %v3202_v3 }
 0x12f   : > { %v968_v16 = vpop.permute.xlu1 %967  ;;  %v1348_v45 = vpop.permute.xlu0 %1347  ;;  %v1606_v12 = vsel %vm1604_vm2, %v1573_v47, %v3377_v5  ;;  %v2663_v5 = vld [vmem:[%s2973_s22 + $0xc9] sm:$0xff] }
 0x130   : > { %v1770_v22 = vsel %vm1769_vm7, %v1737_v63, %v1348_v45  ;;  %v1639_v45 = vsel %vm1637_vm3, %v1606_v12, %v3505_v62 }
 0x131   : > { %863 = vrot.lane.b32.xlu1 %v3578_v31, %s2918_s25  ;;  %1243 = vrot.lane.b32.xlu0 %v3578_v31, %s2921_s10  ;;  %v1672_v63 = vsel %vm1670_vm4, %v1639_v45, %v966_v44  ;;  %v1574_v44 = vsel %vm1571_vm0, %v3220_v24, %v3192_v60 }
 0x132   : > { %v1705_v3 = vsel %vm1703_vm5, %v1672_v63, %v1094_v57 }
 0x133   : > { %v1476_v34 = vpop.permute.xlu1 %1475  ;;  %v1350_v14 = vpop.permute.xlu0 %1349  ;;  %v1738_v46 = vsel %vm1736_vm6, %v1705_v3, %v1222_v15  ;;  %v1607_v15 = vsel %vm1604_vm2, %v1574_v44, %v3387_v56 }
 0x134   : > { %v1803_v39 = vsel %vm1802_vm8, %v1770_v22, %v1476_v34  ;;  %v1771_v22 = vsel %vm1769_vm7, %v1738_v46, %v1350_v14  ;;  %v1640_v14 = vsel %vm1637_vm3, %v1607_v15, %v3513_v43  ;;  %v3637_v43 = vld [vmem:[%s2973_s22 + $0xd8] sm:$0xff] }
 0x135   : > { %1371 = vrot.lane.b32.xlu1 %v3051_v17, %s2922_s13  ;;  %1245 = vrot.lane.b32.xlu0 %v3590_v6, %s2921_s10  ;;  %v1673_v45 = vsel %vm1670_vm4, %v1640_v14, %v968_v16  ;;  %v1575_v16 = vsel %vm1571_vm0, %v3223_v25, %v3200_v1 }
 0x136   : > { %2797 = vmatprep.mubr.msk.f32.mxu0 %vm1840_vm9, %v1803_v39 }
 0x137   : > { %v1096_v61 = vpop.permute.xlu1 %1095  ;;  %v970_v52 = vpop.permute.xlu0 %969 }
 0x138   : > { %v1706_v63 = vsel %vm1703_vm5, %v1673_v45, %v1096_v61  ;;  %v2664_v61 = vld [vmem:[%s2973_s22 + $0xd9] sm:$0xff] }
 0x139   : > { %991 = vrot.lane.b32.xlu1 %v3051_v17, %s2919_s30  ;;  %865 = vrot.lane.b32.xlu0 %v3590_v6, %s2918_s25 }
 0x13b   : > { %v1098_v34 = vpop.permute.xlu1 %1097  ;;  %v1478_v39 = vpop.permute.xlu0 %1477 }
 0x13c   : > { %v1804_v62 = vsel %vm1802_vm8, %v1771_v22, %v1478_v39  ;;  %v3654_v39 = vld [vmem:[%s2973_s22 + $0xe0] sm:$0xff] }
 0x13d   : > { %1499 = vrot.lane.b32.xlu1 %v3162_v49, %s2923_s14  ;;  %1373 = vrot.lane.b32.xlu0 %v2663_v5, %s2922_s13 }
 0x13e   : > { %2798 = vmatmul.mubr.msk.f32.vlgmr.msra.gmra.mrb[0].mxu0 %vm1840_vm9, %v1804_v62 }
 0x13f   : > { %v1226_v17 = vpop.permute.xlu1 %1225  ;;  %v1224_v57 = vpop.permute.xlu0 %1223 }
 0x141   : > { %1119 = vrot.lane.b32.xlu1 %v3162_v49, %s2920_s5  ;;  %993 = vrot.lane.b32.xlu0 %v2663_v5, %s2919_s30  ;;  %v1739_v49 = vsel %vm1736_vm6, %v1706_v63, %v1224_v57 }
 0x143   : > { %v972_v47 = vpop.permute.xlu1 %971  ;;  %v1352_v12 = vpop.permute.xlu0 %1351 }
 0x144   : > { %v1772_v60 = vsel %vm1769_vm7, %v1739_v49, %v1352_v12 }
 0x145   : > { %1121 = vrot.lane.b32.xlu1 %v3159_v48, %s2920_s5  ;;  %1501 = vrot.lane.b32.xlu0 %v3159_v48, %s2923_s14  ;;  %v1608_v48 = vsel %vm1604_vm2, %v1575_v16, %v3385_v0 }
 0x146   : > { %v1641_v46 = vsel %vm1637_vm3, %v1608_v48, %v3511_v10  ;;  %v3700_v48 = vld [vmem:[%s2973_s22 + $0xf0] sm:$0xff] }
 0x147   : > { %v1480_v24 = vpop.permute.xlu1 %1479  ;;  %v1354_v56 = vpop.permute.xlu0 %1353  ;;  %v1674_v1 = vsel %vm1670_vm4, %v1641_v46, %v970_v52  ;;  %v2665_v52 = vld [vmem:[%s2973_s22 + $0xe1] sm:$0xff] }
 0x148   : > { %v1805_v3 = vsel %vm1802_vm8, %v1772_v60, %v1480_v24  ;;  %v1707_v25 = vsel %vm1703_vm5, %v1674_v1, %v1098_v34 }
 0x149   : > { %867 = vrot.lane.b32.xlu1 %v3637_v43, %s2918_s25  ;;  %1247 = vrot.lane.b32.xlu0 %v3637_v43, %s2921_s10  ;;  %v1740_v0 = vsel %vm1736_vm6, %v1707_v25, %v1226_v17  ;;  %v1576_v17 = vsel %vm1571_vm0, %v3241_v30, %v3210_v20 }
 0x14a   : > { %2800 = vmatprep.mubr.msk.f32.mxu0 %vm1840_vm9, %v1805_v3  ;;  %v1773_v62 = vsel %vm1769_vm7, %v1740_v0, %v1354_v56  ;;  %v1609_v14 = vsel %vm1604_vm2, %v1576_v17, %v3395_v37  ;;  %v1578_v0 = vsel %vm1571_vm0, %v3252_v33, %v3217_v23 }
 0x14b   : > { %v1100_v5 = vpop.permute.xlu1 %1099  ;;  %v974_v22 = vpop.permute.xlu0 %973  ;;  %v1642_v12 = vsel %vm1637_vm3, %v1609_v14, %v3521_v40 }
 0x14c   : > { %v1675_v49 = vsel %vm1670_vm4, %v1642_v12, %v972_v47  ;;  %v1577_v47 = vsel %vm1571_vm0, %v3238_v29, %v3208_v19 }
 0x14d   : > { %1375 = vrot.lane.b32.xlu1 %v2664_v61, %s2922_s13  ;;  %1249 = vrot.lane.b32.xlu0 %v3654_v39, %s2921_s10  ;;  %v1708_v60 = vsel %vm1703_vm5, %v1675_v49, %v1100_v5  ;;  %v3712_v5 = vld [vmem:[%s2973_s22 + $0xf8] sm:$0xff] }
 0x14f   : > { %v1102_v57 = vpop.permute.xlu1 %1101  ;;  %v1482_v10 = vpop.permute.xlu0 %1481 }
 0x150   : > { %v1806_v44 = vsel %vm1802_vm8, %v1773_v62, %v1482_v10  ;;  %v1611_v62 = vsel %vm1604_vm2, %v1578_v0, %v3403_v35  ;;  %v2667_v10 = vld [vmem:[%s2973_s22 + $0xf9] sm:$0xff] }
 0x151   : > { %995 = vrot.lane.b32.xlu1 %v2664_v61, %s2919_s30  ;;  %869 = vrot.lane.b32.xlu0 %v3654_v39, %s2918_s25 }
 0x152   : > { %2801 = vmatmul.mubr.msk.f32.gmra.mrb[2].mxu0 %vm1840_vm9, %v1806_v44  ;;  %v1644_v44 = vsel %vm1637_vm3, %v1611_v62, %v3529_v8  ;;  %v1612_v8 = vsel %vm1604_vm2, %v3227_v26, %v3401_v36 }
 0x153   : > { %v1230_v34 = vpop.permute.xlu1 %1229  ;;  %v1228_v15 = vpop.permute.xlu0 %1227 }
 0x154   : > { %v1741_v20 = vsel %vm1736_vm6, %v1708_v60, %v1228_v15 }
 0x155   : > { %1503 = vrot.lane.b32.xlu1 %v3172_v51, %s2923_s14  ;;  %1377 = vrot.lane.b32.xlu0 %v2665_v52, %s2922_s13 }
 0x157   : > { %v976_v45 = vpop.permute.xlu1 %975  ;;  %v1356_v63 = vpop.permute.xlu0 %1355 }
 0x158   : > { %v1774_v30 = vsel %vm1769_vm7, %v1741_v20, %v1356_v63  ;;  %v1677_v15 = vsel %vm1670_vm4, %v1644_v44, %v976_v45  ;;  %v2605_v45 = vld [vmem:[%s2973_s22 + $0xfa] sm:$0xff]  ;;  %v1645_v63 = vsel %vm1637_vm3, %v1612_v8, %v3527_v11 }
 0x159   : > { %1123 = vrot.lane.b32.xlu1 %v3172_v51, %s2920_s5  ;;  %997 = vrot.lane.b32.xlu0 %v2665_v52, %s2919_s30  ;;  %v1610_v51 = vsel %vm1604_vm2, %v1577_v47, %v3393_v4  ;;  %v2666_v4 = vld [vmem:[%s2973_s22 + $0xf1] sm:$0xff]  ;;  %v2668_v47 = vld [vmem:[%s2973_s22 + $0x109] sm:$0xff] }
 0x15a   : > { %v1643_v56 = vsel %vm1637_vm3, %v1610_v51, %v3519_v42 }
 0x15b   : > { %v1484_v37 = vpop.permute.xlu1 %1483  ;;  %v1358_v24 = vpop.permute.xlu0 %1357  ;;  %v1676_v19 = vsel %vm1670_vm4, %v1643_v56, %v974_v22 }
 0x15c   : > { %v1807_v40 = vsel %vm1802_vm8, %v1774_v30, %v1484_v37  ;;  %v1709_v29 = vsel %vm1703_vm5, %v1676_v19, %v1102_v57  ;;  %v2698_v57 = vld [vmem:[%s2973_s22 + $0xf2] sm:$0xff] }
 0x15d   : > { %1125 = vrot.lane.b32.xlu1 %v3169_v50, %s2920_s5  ;;  %1505 = vrot.lane.b32.xlu0 %v3169_v50, %s2923_s14  ;;  %v1742_v50 = vsel %vm1736_vm6, %v1709_v29, %v1230_v34 }
 0x15e   : > { %2803 = vmatprep.mubr.msk.f32.mxu0 %vm1840_vm9, %v1807_v40  ;;  %v1775_v42 = vsel %vm1769_vm7, %v1742_v50, %v1358_v24  ;;  %v3754_v40 = vld [vmem:[%s2973_s22 + $0x108] sm:$0xff] }
 0x15f   : > { %v1104_v3 = vpop.permute.xlu1 %1103  ;;  %v978_v16 = vpop.permute.xlu0 %977 }
 0x160   : > { %v1710_v23 = vsel %vm1703_vm5, %v1677_v15, %v1104_v3  ;;  %v1678_v20 = vsel %vm1670_vm4, %v1645_v63, %v978_v16  ;;  %v3764_v3 = vld [vmem:[%s2973_s22 + $0x110] sm:$0xff]  ;;  %v1580_v16 = vsel %vm1571_vm0, %v3266_v55, %v3235_v28 }
 0x161   : > { %871 = vrot.lane.b32.xlu1 %v3700_v48, %s2918_s25  ;;  %1251 = vrot.lane.b32.xlu0 %v3700_v48, %s2921_s10  ;;  %v1613_v19 = vsel %vm1604_vm2, %v1580_v16, %v3411_v2  ;;  %v2700_v55 = vld [vmem:[%s2973_s22 + $0x10a] sm:$0xff] }
 0x162   : > { %v1646_v29 = vsel %vm1637_vm3, %v1613_v19, %v3537_v41 }
 0x163   : > { %v1106_v61 = vpop.permute.xlu1 %1105  ;;  %v1486_v46 = vpop.permute.xlu0 %1485 }
 0x164   : > { %v1808_v22 = vsel %vm1802_vm8, %v1775_v42, %v1486_v46  ;;  %v1711_v30 = vsel %vm1703_vm5, %v1678_v20, %v1106_v61  ;;  %v2669_v46 = vld [vmem:[%s2973_s22 + $0x111] sm:$0xff] }
 0x165   : > { %1379 = vrot.lane.b32.xlu1 %v2666_v4, %s2922_s13  ;;  %1253 = vrot.lane.b32.xlu0 %v3712_v5, %s2921_s10 }
 0x166   : > { %2804 = vmatmul.mubr.msk.f32.gmra.mrb[4].mxu0 %vm1840_vm9, %v1808_v22 }
 0x167   : > { %v1234_v1 = vpop.permute.xlu1 %1233  ;;  %v1232_v25 = vpop.permute.xlu0 %1231 }
 0x168   : > { %v1743_v33 = vsel %vm1736_vm6, %v1710_v23, %v1232_v25  ;;  %v1744_v26 = vsel %vm1736_vm6, %v1711_v30, %v1234_v1  ;;  %v1581_v25 = vsel %vm1571_vm0, %v3263_v54, %v3233_v27  ;;  %v2607_v54 = vld [vmem:[%s2973_s22 + $0x112] sm:$0xff] }
 0x169   : > { %999 = vrot.lane.b32.xlu1 %v2666_v4, %s2919_s30  ;;  %873 = vrot.lane.b32.xlu0 %v3712_v5, %s2918_s25  ;;  %v1614_v0 = vsel %vm1604_vm2, %v1581_v25, %v3409_v21  ;;  %v2672_v25 = vld [vmem:[%s2973_s22 + $0x139] sm:$0xff] }
 0x16a   : > { %v1647_v62 = vsel %vm1637_vm3, %v1614_v0, %v3535_v13  ;;  %v2641_v0 = vld [vmem:[%s2973_s22 + $0x140] sm:$0xff] }
 0x16b   : > { %v980_v52 = vpop.permute.xlu1 %979  ;;  %v1360_v34 = vpop.permute.xlu0 %1359 }
 0x16c   : > { %v1776_v35 = vsel %vm1769_vm7, %v1743_v33, %v1360_v34  ;;  %v1679_v42 = vsel %vm1670_vm4, %v1646_v29, %v980_v52 }
 0x16d   : > { %1507 = vrot.lane.b32.xlu1 %v2698_v57, %s2923_s14  ;;  %1381 = vrot.lane.b32.xlu0 %v2667_v10, %s2922_s13 }
 0x16f   : > { %v1488_v17 = vpop.permute.xlu1 %1487  ;;  %v1362_v14 = vpop.permute.xlu0 %1361 }
 0x170   : > { %v1809_v12 = vsel %vm1802_vm8, %v1776_v35, %v1488_v17  ;;  %v1777_v36 = vsel %vm1769_vm7, %v1744_v26, %v1362_v14  ;;  %v3808_v35 = vld [vmem:[%s2973_s22 + $0x120] sm:$0xff]  ;;  %v1582_v17 = vsel %vm1571_vm0, %v3280_v59, %v3249_v32 }
 0x171   : > { %1127 = vrot.lane.b32.xlu1 %v2698_v57, %s2920_s5  ;;  %1001 = vrot.lane.b32.xlu0 %v2667_v10, %s2919_s30  ;;  %v1615_v14 = vsel %vm1604_vm2, %v1582_v17, %v3419_v53  ;;  %v4423_v26 = vld [vmem:[#allocation2_spill] sm:$0xff] }
 0x172   : > { %2806 = vmatprep.mubr.msk.f32.mxu0 %vm1840_vm9, %v1809_v12  ;;  %v2670_v12 = vld [vmem:[%s2973_s22 + $0x121] sm:$0xff]  ;;  %v1648_v8 = vsel %vm1637_vm3, %v1615_v14, %v3545_v38 }
 0x173   : > { %v1108_v49 = vpop.permute.xlu1 %1107  ;;  %v982_v60 = vpop.permute.xlu0 %981  ;;  %v4429_v17 = vld [vmem:[#allocation26_spill] sm:$0xff] }
 0x174   : > { %v1712_v61 = vsel %vm1703_vm5, %v1679_v42, %v1108_v49  ;;  %v1680_v44 = vsel %vm1670_vm4, %v1647_v62, %v982_v60  ;;  %v3823_v49 = vld [vmem:[%s2973_s22 + $0x128] sm:$0xff] }
 0x175   : > { %1129 = vrot.lane.b32.xlu1 %v2605_v45, %s2920_s5  ;;  %1509 = vrot.lane.b32.xlu0 %v2605_v45, %s2923_s14  ;;  %v4426_v62 = vld [vmem:[#allocation47_spill] sm:$0xff] }
 0x177   : > { %v1110_v37 = vpop.permute.xlu1 %1109  ;;  %v1490_v24 = vpop.permute.xlu0 %1489 }
 0x178   : > { %v1810_v11 = vsel %vm1802_vm8, %v1777_v36, %v1490_v24  ;;  %v1713_v52 = vsel %vm1703_vm5, %v1680_v44, %v1110_v37  ;;  %v1583_v36 = vsel %vm1571_vm0, %v3277_v58, %v4423_v26  ;;  %v2702_v24 = vld [vmem:[%s2973_s22 + $0x122] sm:$0xff] }
 0x179   : > { %875 = vrot.lane.b32.xlu1 %v3754_v40, %s2918_s25  ;;  %1255 = vrot.lane.b32.xlu0 %v3754_v40, %s2921_s10  ;;  %v1616_v37 = vsel %vm1604_vm2, %v1583_v36, %v3417_v7 }
 0x17a   : > { %2807 = vmatmul.mubr.msk.f32.gmra.mrb[6].mxu0 %vm1840_vm9, %v1810_v11  ;;  %v2671_v11 = vld [vmem:[%s2973_s22 + $0x129] sm:$0xff] }
 0x17b   : > { %v1238_v51 = vpop.permute.xlu1 %1237  ;;  %v1236_v56 = vpop.permute.xlu0 %1235 }
 0x17c   : > { %v1745_v28 = vsel %vm1736_vm6, %v1712_v61, %v1236_v56  ;;  %v1746_v27 = vsel %vm1736_vm6, %v1713_v52, %v1238_v51 }
 0x17d   : > { %1383 = vrot.lane.b32.xlu1 %v2668_v47, %s2922_s13  ;;  %1257 = vrot.lane.b32.xlu0 %v3764_v3, %s2921_s10 }
 0x17f   : > { %v984_v50 = vpop.permute.xlu1 %983  ;;  %v1364_v4 = vpop.permute.xlu0 %1363 }
 0x180   : > { %v1778_v2 = vsel %vm1769_vm7, %v1745_v28, %v1364_v4  ;;  %v1681_v32 = vsel %vm1670_vm4, %v1648_v8, %v984_v50  ;;  %v2546_v28 = vld [vmem:[%s2973_s22 + $0x138] sm:$0xff]  ;;  %v2673_v8 = vld [vmem:[%s2973_s22 + $0x141] sm:$0xff] }
 0x181   : > { %1003 = vrot.lane.b32.xlu1 %v2668_v47, %s2919_s30  ;;  %877 = vrot.lane.b32.xlu0 %v3764_v3, %s2918_s25  ;;  %v1649_v47 = vsel %vm1637_vm3, %v1616_v37, %v3543_v9  ;;  %v2609_v9 = vld [vmem:[%s2973_s22 + $0x12a] sm:$0xff]  ;;  %v2611_v37 = vld [vmem:[%s2973_s22 + $0x142] sm:$0xff] }
 0x183   : > { %v1492_v22 = vpop.permute.xlu1 %1491  ;;  %v1366_v41 = vpop.permute.xlu0 %1365 }
 0x184   : > { %v1811_v1 = vsel %vm1802_vm8, %v1778_v2, %v1492_v22  ;;  %v1779_v21 = vsel %vm1769_vm7, %v1746_v27, %v1366_v41  ;;  %v4424_v2 = vld [vmem:[#allocation4_spill] sm:$0xff]  ;;  %v4425_v41 = vld [vmem:[#allocation27_spill] sm:$0xff] }
 0x185   : > { %1511 = vrot.lane.b32.xlu1 %v2700_v55, %s2923_s14  ;;  %1385 = vrot.lane.b32.xlu0 %v2669_v46, %s2922_s13  ;;  %v1584_v22 = vsel %vm1571_vm0, %v3294_v18, %v4424_v2 }
 0x186   : > { %2809 = vmatprep.mubr.msk.f32.mxu0 %vm1840_vm9, %v1811_v1  ;;  %v1617_v1 = vsel %vm1604_vm2, %v1584_v22, %v4425_v41 }
 0x187   : > { %v1112_v57 = vpop.permute.xlu1 %1111  ;;  %v986_v10 = vpop.permute.xlu0 %985 }
 0x188   : > { %v1714_v59 = vsel %vm1703_vm5, %v1681_v32, %v1112_v57  ;;  %v1682_v58 = vsel %vm1670_vm4, %v1649_v47, %v986_v10  ;;  %v1650_v57 = vsel %vm1637_vm3, %v1617_v1, %v4426_v62  ;;  %v2548_v47 = vld [vmem:[%s2973_s22 + $0x150] sm:$0xff] }
 0x189   : > { %1131 = vrot.lane.b32.xlu1 %v2700_v55, %s2920_s5  ;;  %1005 = vrot.lane.b32.xlu0 %v2669_v46, %s2919_s30 }
 0x18b   : > { %v1114_v34 = vpop.permute.xlu1 %1113  ;;  %v1494_v15 = vpop.permute.xlu0 %1493 }
 0x18c   : > { %v1812_v13 = vsel %vm1802_vm8, %v1779_v21, %v1494_v15  ;;  %v1715_v16 = vsel %vm1703_vm5, %v1682_v58, %v1114_v34  ;;  %v4431_v58 = vld [vmem:[#allocation6_spill] sm:$0xff] }
 0x18d   : > { %1133 = vrot.lane.b32.xlu1 %v2607_v54, %s2920_s5  ;;  %1513 = vrot.lane.b32.xlu0 %v2607_v54, %s2923_s14 }
 0x18e   : > { %2810 = vmatmul.mubr.msk.f32.gmra.mrb[8].mxu0 %vm1840_vm9, %v1812_v13  ;;  %v4427_v13 = vld [vmem:[#allocation3_spill] sm:$0xff] }
 0x18f   : > { %v1242_v23 = vpop.permute.xlu1 %1241  ;;  %v1240_v33 = vpop.permute.xlu0 %1239 }
 0x190   : > { %v1747_v53 = vsel %vm1736_vm6, %v1714_v59, %v1240_v33  ;;  %v1748_v7 = vsel %vm1736_vm6, %v1715_v16, %v1242_v23  ;;  %v4428_v23 = vld [vmem:[#allocation9_spill] sm:$0xff] }
 0x191   : > { %879 = vrot.lane.b32.xlu1 %v3808_v35, %s2918_s25  ;;  %1259 = vrot.lane.b32.xlu0 %v3808_v35, %s2921_s10  ;;  %v1585_v33 = vsel %vm1571_vm0, %v4428_v23, %v4427_v13  ;;  %v4432_v16 = vld [vmem:[#allocation13_spill] sm:$0xff] }
 0x192   : > { %v1618_v14 = vsel %vm1604_vm2, %v1585_v33, %v4429_v17 }
 0x193   : > { %v988_v45 = vpop.permute.xlu1 %987  ;;  %v1368_v63 = vpop.permute.xlu0 %1367 }
 0x194   : > { %v1780_v60 = vsel %vm1769_vm7, %v1747_v53, %v1368_v63  ;;  %v1683_v52 = vsel %vm1670_vm4, %v1650_v57, %v988_v45  ;;  %v4430_v45 = vld [vmem:[#allocation46_spill] sm:$0xff]  ;;  %v4436_v57 = vld [vmem:[#allocation28_spill] sm:$0xff] }
 0x195   : > { %1387 = vrot.lane.b32.xlu1 %v2670_v12, %s2922_s13  ;;  %1261 = vrot.lane.b32.xlu0 %v3823_v49, %s2921_s10  ;;  %v1651_v63 = vsel %vm1637_vm3, %v1618_v14, %v4430_v45  ;;  %v2550_v45 = vld [vmem:[%s2973_s22 + $0x168] sm:$0xff] }
 0x197   : > { %v1496_v38 = vpop.permute.xlu1 %1495  ;;  %v1370_v20 = vpop.permute.xlu0 %1369 }
 0x198   : > { %v1813_v30 = vsel %vm1802_vm8, %v1780_v60, %v1496_v38  ;;  %v1781_v19 = vsel %vm1769_vm7, %v1748_v7, %v1370_v20  ;;  %v1586_v7 = vsel %vm1571_vm0, %v4432_v16, %v4431_v58  ;;  %v4439_v16 = vld [vmem:[#allocation7_spill] sm:$0xff] }
 0x199   : > { %1007 = vrot.lane.b32.xlu1 %v2670_v12, %s2919_s30  ;;  %881 = vrot.lane.b32.xlu0 %v3823_v49, %s2918_s25  ;;  %v2704_v12 = vld [vmem:[%s2973_s22 + $0x13a] sm:$0xff] }
 0x19a   : > { %2812 = vmatprep.mubr.msk.f32.mxu0 %vm1840_vm9, %v1813_v30 }
 0x19b   : > { %v1116_v51 = vpop.permute.xlu1 %1115  ;;  %v990_v56 = vpop.permute.xlu0 %989 }
 0x19c   : > { %v1716_v18 = vsel %vm1703_vm5, %v1683_v52, %v1116_v51  ;;  %v1684_v53 = vsel %vm1670_vm4, %v1651_v63, %v990_v56  ;;  %v2706_v52 = vld [vmem:[%s2973_s22 + $0x152] sm:$0xff] }
 0x19d   : > { %1515 = vrot.lane.b32.xlu1 %v2702_v24, %s2923_s14  ;;  %1389 = vrot.lane.b32.xlu0 %v2671_v11, %s2922_s13 }
 0x19f   : > { %v1118_v29 = vpop.permute.xlu1 %1117  ;;  %v1498_v50 = vpop.permute.xlu0 %1497 }
 0x1a0   : > { %v1814_v4 = vsel %vm1802_vm8, %v1781_v19, %v1498_v50  ;;  %v1717_v60 = vsel %vm1703_vm5, %v1684_v53, %v1118_v29  ;;  %v4433_v19 = vld [vmem:[#allocation29_spill] sm:$0xff] }
 0x1a1   : > { %1135 = vrot.lane.b32.xlu1 %v2702_v24, %s2920_s5  ;;  %1009 = vrot.lane.b32.xlu0 %v2671_v11, %s2919_s30  ;;  %v1619_v29 = vsel %vm1604_vm2, %v1586_v7, %v4433_v19  ;;  %v2674_v50 = vld [vmem:[%s2973_s22 + $0x151] sm:$0xff]  ;;  %v1589_v7 = vsel %vm1571_vm0, %v3590_v6, %v4439_v16  ;;  %v4440_v19 = vld [vmem:[#allocation30_spill] sm:$0xff] }
 0x1a2   : > { %2813 = vmatmul.mubr.msk.f32.gmra.mrb[10].mxu0 %vm1840_vm9, %v1814_v4  ;;  %v2643_v4 = vld [vmem:[%s2973_s22 + $0x158] sm:$0xff] }
 0x1a3   : > { %v864_v42 = vpop.permute.xlu1 %863  ;;  %v1244_v61 = vpop.permute.xlu0 %1243  ;;  %v2648_v16 = vld [vmem:[%s2973_s22 + $0x198] sm:$0xff] }
 0x1a4   : > { %v1749_v27 = vsel %vm1736_vm6, %v1716_v18, %v1244_v61  ;;  %v2675_v18 = vld [vmem:[%s2973_s22 + $0x159] sm:$0xff] }
 0x1a5   : > { %1137 = vrot.lane.b32.xlu1 %v2609_v9, %s2920_s5  ;;  %1517 = vrot.lane.b32.xlu0 %v2609_v9, %s2923_s14  ;;  %v1652_v9 = vsel %vm1637_vm3, %v1619_v29, %v864_v42  ;;  %v1622_v29 = vsel %vm1604_vm2, %v1589_v7, %v4440_v19 }
 0x1a7   : > { %v1372_v55 = vpop.permute.xlu1 %1371  ;;  %v1246_v46 = vpop.permute.xlu0 %1245 }
 0x1a8   : > { %v1782_v54 = vsel %vm1769_vm7, %v1749_v27, %v1372_v55  ;;  %v1750_v38 = vsel %vm1736_vm6, %v1717_v60, %v1246_v46  ;;  %v4438_v60 = vld [vmem:[#allocation31_spill] sm:$0xff] }
 0x1a9   : > { %883 = vrot.lane.b32.xlu1 %v2546_v28, %s2918_s25  ;;  %1263 = vrot.lane.b32.xlu0 %v2546_v28, %s2921_s10 }
 0x1ab   : > { %v992_v10 = vpop.permute.xlu1 %991  ;;  %v3871_v44 = vpop.permute.xlu0 %865 }
 0x1ac   : > { %v1685_v55 = vsel %vm1670_vm4, %v1652_v9, %v992_v10 }
 0x1ad   : > { %1391 = vrot.lane.b32.xlu1 %v2672_v25, %s2922_s13  ;;  %1265 = vrot.lane.b32.xlu0 %v2641_v0, %s2921_s10 }
 0x1af   : > { %v1500_v21 = vpop.permute.xlu1 %1499  ;;  %v1374_v34 = vpop.permute.xlu0 %1373 }
 0x1b0   : > { %v1815_v15 = vsel %vm1802_vm8, %v1782_v54, %v1500_v21  ;;  %v1783_v20 = vsel %vm1769_vm7, %v1750_v38, %v1374_v34 }
 0x1b1   : > { %1011 = vrot.lane.b32.xlu1 %v2672_v25, %s2919_s30  ;;  %885 = vrot.lane.b32.xlu0 %v2641_v0, %s2918_s25  ;;  %v4434_v25 = vld [vmem:[#allocation5_spill] sm:$0xff]  ;;  %v4435_v0 = vld [vmem:[#allocation12_spill] sm:$0xff] }
 0x1b2   : > { %2815 = vmatprep.mubr.msk.f32.mxu0 %vm1840_vm9, %v1815_v15  ;;  %v1587_v62 = vsel %vm1571_vm0, %v4435_v0, %v4434_v25 }
 0x1b3   : > { %v1120_v32 = vpop.permute.xlu1 %1119  ;;  %v994_v59 = vpop.permute.xlu0 %993  ;;  %v1620_v10 = vsel %vm1604_vm2, %v1587_v62, %v4436_v57  ;;  %v2552_v62 = vld [vmem:[%s2973_s22 + $0x180] sm:$0xff] }
 0x1b4   : > { %v1718_v46 = vsel %vm1703_vm5, %v1685_v55, %v1120_v32  ;;  %v1653_v27 = vsel %vm1637_vm3, %v1620_v10, %v3871_v44  ;;  %v2613_v44 = vld [vmem:[%s2973_s22 + $0x15a] sm:$0xff] }
 0x1b5   : > { %1519 = vrot.lane.b32.xlu1 %v2704_v12, %s2923_s14  ;;  %1393 = vrot.lane.b32.xlu0 %v2673_v8, %s2922_s13  ;;  %v1686_v34 = vsel %vm1670_vm4, %v1653_v27, %v994_v59  ;;  %v4437_v59 = vld [vmem:[#allocation8_spill] sm:$0xff]  ;;  %v4442_v27 = vld [vmem:[#allocation33_spill] sm:$0xff] }
 0x1b6   : > { %v1588_v53 = vsel %vm1571_vm0, %v3578_v31, %v4437_v59 }
 0x1b7   : > { %v1122_v30 = vpop.permute.xlu1 %1121  ;;  %v1502_v26 = vpop.permute.xlu0 %1501  ;;  %v1621_v38 = vsel %vm1604_vm2, %v1588_v53, %v4438_v60  ;;  %v2710_v53 = vld [vmem:[%s2973_s22 + $0x182] sm:$0xff] }
 0x1b8   : > { %v1816_v36 = vsel %vm1802_vm8, %v1783_v20, %v1502_v26  ;;  %v1719_v15 = vsel %vm1703_vm5, %v1686_v34, %v1122_v30  ;;  %v2676_v20 = vld [vmem:[%s2973_s22 + $0x169] sm:$0xff] }
 0x1b9   : > { %1139 = vrot.lane.b32.xlu1 %v2704_v12, %s2920_s5  ;;  %1013 = vrot.lane.b32.xlu0 %v2673_v8, %s2919_s30  ;;  %v2645_v30 = vld [vmem:[%s2973_s22 + $0x170] sm:$0xff]  ;;  %v2647_v34 = vld [vmem:[%s2973_s22 + $0x188] sm:$0xff] }
 0x1ba   : > { %2816 = vmatmul.mubr.msk.f32.gmra.mrb[12].mxu0 %vm1840_vm9, %v1816_v36  ;;  %v2679_v60 = vld [vmem:[%s2973_s22 + $0x189] sm:$0xff] }
 0x1bb   : > { %v868_v24 = vpop.permute.xlu1 %867  ;;  %v1248_v11 = vpop.permute.xlu0 %1247 }
 0x1bc   : > { %v1751_v2 = vsel %vm1736_vm6, %v1718_v46, %v1248_v11  ;;  %v1654_v26 = vsel %vm1637_vm3, %v1621_v38, %v868_v24 }
 0x1bd   : > { %1141 = vrot.lane.b32.xlu1 %v2611_v37, %s2920_s5  ;;  %1521 = vrot.lane.b32.xlu0 %v2611_v37, %s2923_s14 }
 0x1bf   : > { %v1376_v51 = vpop.permute.xlu1 %1375  ;;  %v1250_v56 = vpop.permute.xlu0 %1249 }
 0x1c0   : > { %v1784_v22 = vsel %vm1769_vm7, %v1751_v2, %v1376_v51  ;;  %v1752_v13 = vsel %vm1736_vm6, %v1719_v15, %v1250_v56 }
 0x1c1   : > { %887 = vrot.lane.b32.xlu1 %v2548_v47, %s2918_s25  ;;  %1267 = vrot.lane.b32.xlu0 %v2548_v47, %s2921_s10 }
 0x1c3   : > { %v996_v61 = vpop.permute.xlu1 %995  ;;  %v3916_v28 = vpop.permute.xlu0 %869 }
 0x1c4   : > { %v1687_v11 = vsel %vm1670_vm4, %v1654_v26, %v996_v61  ;;  %v1655_v9 = vsel %vm1637_vm3, %v1622_v29, %v3916_v28  ;;  %v2615_v28 = vld [vmem:[%s2973_s22 + $0x172] sm:$0xff]  ;;  %v4445_v29 = vld [vmem:[#allocation15_spill] sm:$0xff] }
 0x1c5   : > { %1395 = vrot.lane.b32.xlu1 %v2674_v50, %s2922_s13  ;;  %1269 = vrot.lane.b32.xlu0 %v2643_v4, %s2921_s10 }
 0x1c7   : > { %v1504_v41 = vpop.permute.xlu1 %1503  ;;  %v1378_v1 = vpop.permute.xlu0 %1377 }
 0x1c8   : > { %v1817_v42 = vsel %vm1802_vm8, %v1784_v22, %v1504_v41  ;;  %v1785_v23 = vsel %vm1769_vm7, %v1752_v13, %v1378_v1 }
 0x1c9   : > { %1015 = vrot.lane.b32.xlu1 %v2674_v50, %s2919_s30  ;;  %889 = vrot.lane.b32.xlu0 %v2643_v4, %s2918_s25  ;;  %v2708_v50 = vld [vmem:[%s2973_s22 + $0x16a] sm:$0xff] }
 0x1ca   : > { %2818 = vmatprep.mubr.msk.f32.mxu0 %vm1840_vm9, %v1817_v42  ;;  %v2677_v4 = vld [vmem:[%s2973_s22 + $0x171] sm:$0xff] }
 0x1cb   : > { %v1124_v54 = vpop.permute.xlu1 %1123  ;;  %v998_v21 = vpop.permute.xlu0 %997 }
 0x1cc   : > { %v1720_v31 = vsel %vm1703_vm5, %v1687_v11, %v1124_v54  ;;  %v1688_v46 = vsel %vm1670_vm4, %v1655_v9, %v998_v21  ;;  %v2678_v21 = vld [vmem:[%s2973_s22 + $0x181] sm:$0xff] }
 0x1cd   : > { %1523 = vrot.lane.b32.xlu1 %v2706_v52, %s2923_s14  ;;  %1397 = vrot.lane.b32.xlu0 %v2675_v18, %s2922_s13 }
 0x1cf   : > { %v1126_v33 = vpop.permute.xlu1 %1125  ;;  %v1506_v17 = vpop.permute.xlu0 %1505 }
 0x1d0   : > { %v1818_v14 = vsel %vm1802_vm8, %v1785_v23, %v1506_v17  ;;  %v1721_v6 = vsel %vm1703_vm5, %v1688_v46, %v1126_v33 }
 0x1d1   : > { %1143 = vrot.lane.b32.xlu1 %v2706_v52, %s2920_s5  ;;  %1017 = vrot.lane.b32.xlu0 %v2675_v18, %s2919_s30  ;;  %v4441_v52 = vld [vmem:[#allocation11_spill] sm:$0xff] }
 0x1d2   : > { %2819 = vmatmul.mubr.msk.f32.gmra.mrb[14].mxu0 %vm1840_vm9, %v1818_v14  ;;  %v1590_v18 = vsel %vm1571_vm0, %v3637_v43, %v4441_v52 }
 0x1d3   : > { %v872_v12 = vpop.permute.xlu1 %871  ;;  %v1252_v8 = vpop.permute.xlu0 %1251  ;;  %v1623_v54 = vsel %vm1604_vm2, %v1590_v18, %v4442_v27  ;;  %v4448_v18 = vld [vmem:[#allocation34_spill] sm:$0xff] }
 0x1d4   : > { %v1753_v47 = vsel %vm1736_vm6, %v1720_v31, %v1252_v8  ;;  %v1656_v15 = vsel %vm1637_vm3, %v1623_v54, %v872_v12 }
 0x1d5   : > { %1145 = vrot.lane.b32.xlu1 %v2613_v44, %s2920_s5  ;;  %1525 = vrot.lane.b32.xlu0 %v2613_v44, %s2923_s14 }
 0x1d7   : > { %v1380_v63 = vpop.permute.xlu1 %1379  ;;  %v1254_v32 = vpop.permute.xlu0 %1253 }
 0x1d8   : > { %v1786_v51 = vsel %vm1769_vm7, %v1753_v47, %v1380_v63  ;;  %v1754_v2 = vsel %vm1736_vm6, %v1721_v6, %v1254_v32  ;;  %v4444_v32 = vld [vmem:[#allocation32_spill] sm:$0xff] }
 0x1d9   : > { %891 = vrot.lane.b32.xlu1 %v2550_v45, %s2918_s25  ;;  %1271 = vrot.lane.b32.xlu0 %v2550_v45, %s2921_s10  ;;  %v4443_v45 = vld [vmem:[#allocation10_spill] sm:$0xff] }
 0x1da   : > { %v1591_v63 = vsel %vm1571_vm0, %v3654_v39, %v4443_v45 }
 0x1db   : > { %v1000_v36 = vpop.permute.xlu1 %999  ;;  %v3961_v37 = vpop.permute.xlu0 %873  ;;  %v1624_v59 = vsel %vm1604_vm2, %v1591_v63, %v4444_v32 }
 0x1dc   : > { %v1689_v33 = vsel %vm1670_vm4, %v1656_v15, %v1000_v36  ;;  %v1657_v38 = vsel %vm1637_vm3, %v1624_v59, %v3961_v37 }
 0x1dd   : > { %1399 = vrot.lane.b32.xlu1 %v2676_v20, %s2922_s13  ;;  %1273 = vrot.lane.b32.xlu0 %v2645_v30, %s2921_s10 }
 0x1df   : > { %v1508_v56 = vpop.permute.xlu1 %1507  ;;  %v1382_v58 = vpop.permute.xlu0 %1381 }
 0x1e0   : > { %v1819_v24 = vsel %vm1802_vm8, %v1786_v51, %v1508_v56  ;;  %v1787_v22 = vsel %vm1769_vm7, %v1754_v2, %v1382_v58  ;;  %v2617_v51 = vld [vmem:[%s2973_s22 + $0x18a] sm:$0xff] }
 0x1e1   : > { %1019 = vrot.lane.b32.xlu1 %v2676_v20, %s2919_s30  ;;  %893 = vrot.lane.b32.xlu0 %v2645_v30, %s2918_s25 }
 0x1e2   : > { %2821 = vmatprep.mubr.msk.f32.mxu1 %vm1840_vm9, %v1819_v24  ;;  %v2649_v24 = vld [vmem:[%s2973_s22 + $0x1a0] sm:$0xff] }
 0x1e3   : > { %v1128_v61 = vpop.permute.xlu1 %1127  ;;  %v1002_v55 = vpop.permute.xlu0 %1001 }
 0x1e4   : > { %v1722_v43 = vsel %vm1703_vm5, %v1689_v33, %v1128_v61  ;;  %v1690_v26 = vsel %vm1670_vm4, %v1657_v38, %v1002_v55  ;;  %v2681_v61 = vld [vmem:[%s2973_s22 + $0x1a1] sm:$0xff]  ;;  %v2680_v55 = vld [vmem:[%s2973_s22 + $0x199] sm:$0xff] }
 0x1e5   : > { %1527 = vrot.lane.b32.xlu1 %v2708_v50, %s2923_s14  ;;  %1401 = vrot.lane.b32.xlu0 %v2677_v4, %s2922_s13 }
 0x1e7   : > { %v1130_v41 = vpop.permute.xlu1 %1129  ;;  %v1510_v1 = vpop.permute.xlu0 %1509 }
 0x1e8   : > { %v1820_v42 = vsel %vm1802_vm8, %v1787_v22, %v1510_v1  ;;  %v1723_v39 = vsel %vm1703_vm5, %v1690_v26, %v1130_v41  ;;  %v2713_v1 = vld [vmem:[%s2973_s22 + $0x1a2] sm:$0xff]  ;;  %v4449_v26 = vld [vmem:[#allocation17_spill] sm:$0xff] }
 0x1e9   : > { %1147 = vrot.lane.b32.xlu1 %v2708_v50, %s2920_s5  ;;  %1021 = vrot.lane.b32.xlu0 %v2677_v4, %s2919_s30  ;;  %v1592_v50 = vsel %vm1571_vm0, %v3700_v48, %v4445_v29  ;;  %v4446_v4 = vld [vmem:[#allocation35_spill] sm:$0xff] }
 0x1ea   : > { %2822 = vmatmul.mubr.msk.f32.vlgmr.msra.gmra.mrb[0].mxu1 %vm1840_vm9, %v1820_v42  ;;  %v1625_v9 = vsel %vm1604_vm2, %v1592_v50, %v4446_v4  ;;  %v2712_v42 = vld [vmem:[%s2973_s22 + $0x19a] sm:$0xff] }
 0x1eb   : > { %v3993_v25 = vpop.permute.xlu1 %875  ;;  %v1256_v0 = vpop.permute.xlu0 %1255 }
 0x1ec   : > { %v1755_v17 = vsel %vm1736_vm6, %v1722_v43, %v1256_v0  ;;  %v1658_v46 = vsel %vm1637_vm3, %v1625_v9, %v3993_v25 }
 0x1ed   : > { %1149 = vrot.lane.b32.xlu1 %v2615_v28, %s2920_s5  ;;  %1529 = vrot.lane.b32.xlu0 %v2615_v28, %s2923_s14 }
 0x1ef   : > { %v1384_v57 = vpop.permute.xlu1 %1383  ;;  %v1258_v10 = vpop.permute.xlu0 %1257 }
 0x1f0   : > { %v1788_v14 = vsel %vm1769_vm7, %v1755_v17, %v1384_v57  ;;  %v1756_v36 = vsel %vm1736_vm6, %v1723_v39, %v1258_v10  ;;  %v4447_v57 = vld [vmem:[#allocation14_spill] sm:$0xff]  ;;  %v1594_v39 = vsel %vm1571_vm0, %v3754_v40, %v4449_v26 }
 0x1f1   : > { %895 = vrot.lane.b32.xlu1 %v2552_v62, %s2918_s25  ;;  %1275 = vrot.lane.b32.xlu0 %v2552_v62, %s2921_s10  ;;  %v1593_v10 = vsel %vm1571_vm0, %v3712_v5, %v4447_v57 }
 0x1f2   : > { %v1626_v27 = vsel %vm1604_vm2, %v1593_v10, %v4448_v18 }
 0x1f3   : > { %v1004_v13 = vpop.permute.xlu1 %1003  ;;  %v4008_v23 = vpop.permute.xlu0 %877 }
 0x1f4   : > { %v1691_v22 = vsel %vm1670_vm4, %v1658_v46, %v1004_v13  ;;  %v1659_v15 = vsel %vm1637_vm3, %v1626_v27, %v4008_v23 }
 0x1f5   : > { %1403 = vrot.lane.b32.xlu1 %v2678_v21, %s2922_s13  ;;  %1277 = vrot.lane.b32.xlu0 %v2647_v34, %s2921_s10 }
 0x1f7   : > { %v1512_v44 = vpop.permute.xlu1 %1511  ;;  %v1386_v8 = vpop.permute.xlu0 %1385 }
 0x1f8   : > { %v1821_v12 = vsel %vm1802_vm8, %v1788_v14, %v1512_v44  ;;  %v1789_v11 = vsel %vm1769_vm7, %v1756_v36, %v1386_v8  ;;  %v4450_v36 = vld [vmem:[#allocation37_spill] sm:$0xff] }
 0x1f9   : > { %1023 = vrot.lane.b32.xlu1 %v2678_v21, %s2919_s30  ;;  %897 = vrot.lane.b32.xlu0 %v2647_v34, %s2918_s25  ;;  %s250_s25 = scalar_lea.vmem %s4372_s3, %s4474_s15 }
 0x1fa   : > { %2824 = vmatprep.mubr.msk.f32.mxu1 %vm1840_vm9, %v1821_v12 }
 0x1fb   : > { %v1132_v20 = vpop.permute.xlu1 %1131  ;;  %v1006_v30 = vpop.permute.xlu0 %1005 }
 0x1fc   : > { %v1724_v48 = vsel %vm1703_vm5, %v1691_v22, %v1132_v20  ;;  %v1692_v17 = vsel %vm1670_vm4, %v1659_v15, %v1006_v30 }
 0x1fd   : > { %1531 = vrot.lane.b32.xlu1 %v2710_v53, %s2923_s14  ;;  %1405 = vrot.lane.b32.xlu0 %v2679_v60, %s2922_s13 }
 0x1ff   : > { %v1134_v31 = vpop.permute.xlu1 %1133  ;;  %v1514_v47 = vpop.permute.xlu0 %1513 }
 0x200   : > { %v1822_v37 = vsel %vm1802_vm8, %v1789_v11, %v1514_v47  ;;  %v1725_v8 = vsel %vm1703_vm5, %v1692_v17, %v1134_v31  ;;  %v1627_v11 = vsel %vm1604_vm2, %v1594_v39, %v4450_v36  ;;  %v4454_v17 = vld [vmem:[#allocation39_spill] sm:$0xff] }
 0x201   : > { %1151 = vrot.lane.b32.xlu1 %v2710_v53, %s2920_s5  ;;  %1025 = vrot.lane.b32.xlu0 %v2679_v60, %s2919_s30 }
 0x202   : > { %2825 = vmatmul.mubr.msk.f32.gmra.mrb[2].mxu1 %vm1840_vm9, %v1822_v37 }
 0x203   : > { %v4040_v56 = vpop.permute.xlu1 %879  ;;  %v1260_v58 = vpop.permute.xlu0 %1259 }
 0x204   : > { %v1757_v41 = vsel %vm1736_vm6, %v1724_v48, %v1260_v58  ;;  %v1660_v31 = vsel %vm1637_vm3, %v1627_v11, %v4040_v56  ;;  %v4452_v48 = vld [vmem:[#allocation36_spill] sm:$0xff] }
 0x205   : > { %1153 = vrot.lane.b32.xlu1 %v2617_v51, %s2920_s5  ;;  %1533 = vrot.lane.b32.xlu0 %v2617_v51, %s2923_s14 }
 0x207   : > { %v1388_v7 = vpop.permute.xlu1 %1387  ;;  %v1262_v19 = vpop.permute.xlu0 %1261 }
 0x208   : > { %v1790_v28 = vsel %vm1769_vm7, %v1757_v41, %v1388_v7  ;;  %v1758_v45 = vsel %vm1736_vm6, %v1725_v8, %v1262_v19 }
 0x209   : > { %1281 = vrot.lane.b32.xlu1 %v2649_v24, %s2921_s10  ;;  %1279 = vrot.lane.b32.xlu0 %v2648_v16, %s2921_s10 }
 0x20b   : > { %v1008_v6 = vpop.permute.xlu1 %1007  ;;  %v4057_v2 = vpop.permute.xlu0 %881 }
 0x20c   : > { %v1693_v51 = vsel %vm1670_vm4, %v1660_v31, %v1008_v6 }
 0x20d   : > { %1409 = vrot.lane.b32.xlu1 %v2681_v61, %s2922_s13  ;;  %1407 = vrot.lane.b32.xlu0 %v2680_v55, %s2922_s13  ;;  %v4451_v55 = vld [vmem:[#allocation16_spill] sm:$0xff] }
 0x20e   : > { %v1595_v46 = vsel %vm1571_vm0, %v3764_v3, %v4451_v55 }
 0x20f   : > { %v1516_v0 = vpop.permute.xlu1 %1515  ;;  %v1390_v25 = vpop.permute.xlu0 %1389  ;;  %v1628_v41 = vsel %vm1604_vm2, %v1595_v46, %v4452_v48 }
 0x210   : > { %v1823_v62 = vsel %vm1802_vm8, %v1790_v28, %v1516_v0  ;;  %v1791_v23 = vsel %vm1769_vm7, %v1758_v45, %v1390_v25  ;;  %v1661_v28 = vsel %vm1637_vm3, %v1628_v41, %v4057_v2 }
 0x211   : > { %v2799_v52 = vpop.f32.mrb[0].mxu0  ;;  %1537 = vrot.lane.b32.xlu1 %v2713_v1, %s2923_s14  ;;  %1535 = vrot.lane.b32.xlu0 %v2712_v42, %s2923_s14 }
 0x212   : > { %v2167_v54 = vsel %vm1604_vm2, %v2799_v52, 0.0  ;;  %v2238_v21 = vmul.f32 %v2799_v52, %v2799_v52  ;;  %2340 = vst.msk [vmem:[%s4071_s23 + $0x8] sm:$0xff] %vm1604_vm2, %v2799_v52  ;;  %v2007_v34 = vpop.f32.mrb[1].mxu0  ;;  %2827 = vmatprep.mubr.msk.f32.mxu1 %vm1840_vm9, %v1823_v62 }
 0x213   : > { %v2166_v5 = vsel %vm1604_vm2, %v2007_v34, 0.0  ;;  %v2237_v13 = vmul.f32 %v2007_v34, %v2007_v34  ;;  %2339 = vst.msk [vmem:[%s4071_s23] sm:$0xff] %vm1604_vm2, %v2007_v34  ;;  %v1136_v33 = vpop.permute.xlu1 %1135  ;;  %v1010_v43 = vpop.permute.xlu0 %1009 }
 0x214   : > { %v2270_v14 = vsel %vm1604_vm2, %v2238_v21, 0.0  ;;  %v2168_v44 = vadd.f32 %v2167_v54, %v2166_v5  ;;  %v1726_v58 = vsel %vm1703_vm5, %v1693_v51, %v1136_v33  ;;  %v1694_v3 = vsel %vm1670_vm4, %v1661_v28, %v1010_v43 }
 0x215   : > { %v2269_v12 = vsel %vm1604_vm2, %v2237_v13, 0.0  ;;  %v4453_v13 = vld [vmem:[#allocation19_spill] sm:$0xff] }
 0x216   : > { %v2271_v63 = vadd.f32 %v2270_v14, %v2269_v12  ;;  %v1596_v33 = vsel %vm1571_vm0, %v3808_v35, %v4453_v13 }
 0x217   : > { %v1138_v32 = vpop.permute.xlu1 %1137  ;;  %v1518_v59 = vpop.permute.xlu0 %1517  ;;  %v1629_v14 = vsel %vm1604_vm2, %v1596_v33, %v4454_v17  ;;  %v284_v17 = vld [vmem:[%s2973_s22 + $0x140] sm:$0xff] }
 0x218   : > { %v1824_v53 = vsel %vm1802_vm8, %v1791_v23, %v1518_v59  ;;  %v1727_v10 = vsel %vm1703_vm5, %v1694_v3, %v1138_v32 }
 0x219   : > { %2828 = vmatmul.mubr.msk.f32.gmra.mrb[4].mxu1 %vm1840_vm9, %v1824_v53 }
 0x21b   : > { %v884_v60 = vpop.permute.xlu1 %883  ;;  %v1264_v38 = vpop.permute.xlu0 %1263 }
 0x21c   : > { %v1759_v16 = vsel %vm1736_vm6, %v1726_v58, %v1264_v38  ;;  %v1662_v8 = vsel %vm1637_vm3, %v1629_v14, %v884_v60  ;;  %v4455_v58 = vld [vmem:[#allocation18_spill] sm:$0xff] }
 0x21f   : > { %v1392_v20 = vpop.permute.xlu1 %1391  ;;  %v1266_v30 = vpop.permute.xlu0 %1265 }
 0x220   : > { %v1792_v40 = vsel %vm1769_vm7, %v1759_v16, %v1392_v20  ;;  %v1760_v52 = vsel %vm1736_vm6, %v1727_v10, %v1266_v30  ;;  %v4456_v16 = vld [vmem:[#allocation38_spill] sm:$0xff] }
 0x223   : > { %v1012_v47 = vpop.permute.xlu1 %1011  ;;  %v4105_v37 = vpop.permute.xlu0 %885 }
 0x224   : > { %v1695_v35 = vsel %vm1670_vm4, %v1662_v8, %v1012_v47 }
 0x225   : > { %v2802_v24 = vpop.f32.mrb[2].mxu0 }
 0x226   : > { %2342 = vst.msk [vmem:[%s4071_s23 + $0x18] sm:$0xff] %vm1604_vm2, %v2802_v24  ;;  %v2017_v7 = vpop.f32.mrb[3].mxu0  ;;  %v2240_v19 = vmul.f32 %v2802_v24, %v2802_v24  ;;  %v2171_v6 = vsel %vm1604_vm2, %v2802_v24, 0.0  ;;  %v1597_v24 = vsel %vm1571_vm0, %v3823_v49, %v4455_v58 }
 0x227   : > { %v2169_v29 = vsel %vm1604_vm2, %v2017_v7, 0.0  ;;  %v2239_v50 = vmul.f32 %v2017_v7, %v2017_v7  ;;  %2341 = vst.msk [vmem:[%s4071_s23 + $0x10] sm:$0xff] %vm1604_vm2, %v2017_v7  ;;  %v1520_v56 = vpop.permute.xlu1 %1519  ;;  %v1394_v4 = vpop.permute.xlu0 %1393  ;;  %v1630_v7 = vsel %vm1604_vm2, %v1597_v24, %v4456_v16 }
 0x228   : > { %v2170_v9 = vadd.f32 %v2169_v29, %v2168_v44  ;;  %v1825_v61 = vsel %vm1802_vm8, %v1792_v40, %v1520_v56  ;;  %v2274_v0 = vsel %vm1604_vm2, %v2240_v19, 0.0  ;;  %v1793_v18 = vsel %vm1769_vm7, %v1760_v52, %v1394_v4  ;;  %v4458_v52 = vld [vmem:[#allocation41_spill] sm:$0xff] }
 0x229   : > { %v2272_v22 = vsel %vm1604_vm2, %v2239_v50, 0.0  ;;  %2830 = vmatprep.mubr.msk.f32.mxu1 %vm1840_vm9, %v1825_v61  ;;  %v1663_v40 = vsel %vm1637_vm3, %v1630_v7, %v4105_v37 }
 0x22a   : > { %v2273_v1 = vadd.f32 %v2272_v22, %v2271_v63  ;;  %v2172_v42 = vadd.f32 %v2171_v6, %v2170_v9  ;;  %v283_v22 = vld [vmem:[%s2973_s22 + $0x138] sm:$0xff] }
 0x22b   : > { %v1140_v25 = vpop.permute.xlu1 %1139  ;;  %v1014_v62 = vpop.permute.xlu0 %1013 }
 0x22c   : > { %v2275_v57 = vadd.f32 %v2274_v0, %v2273_v1  ;;  %v1728_v53 = vsel %vm1703_vm5, %v1695_v35, %v1140_v25  ;;  %v1696_v50 = vsel %vm1670_vm4, %v1663_v40, %v1014_v62  ;;  %v4457_v62 = vld [vmem:[#allocation21_spill] sm:$0xff]  ;;  %v4460_v35 = vld [vmem:[#allocation40_spill] sm:$0xff] }
 0x22d   : > { %v1598_v3 = vsel %vm1571_vm0, %v283_v22, %v4457_v62 }
 0x22f   : > { %v1142_v27 = vpop.permute.xlu1 %1141  ;;  %v1522_v54 = vpop.permute.xlu0 %1521 }
 0x230   : > { %v1826_v21 = vsel %vm1802_vm8, %v1793_v18, %v1522_v54  ;;  %v1729_v56 = vsel %vm1703_vm5, %v1696_v50, %v1142_v27  ;;  %v1631_v18 = vsel %vm1604_vm2, %v1598_v3, %v4458_v52  ;;  %v4463_v52 = vld [vmem:[#allocation22_spill] sm:$0xff] }
 0x231   : > { %2831 = vmatmul.mubr.msk.f32.gmra.mrb[6].mxu1 %vm1840_vm9, %v1826_v21 }
 0x233   : > { %v4134_v2 = vpop.permute.xlu1 %887  ;;  %v1268_v34 = vpop.permute.xlu0 %1267 }
 0x234   : > { %v1761_v60 = vsel %vm1736_vm6, %v1728_v53, %v1268_v34  ;;  %v1664_v21 = vsel %vm1637_vm3, %v1631_v18, %v4134_v2 }
 0x237   : > { %v1396_v15 = vpop.permute.xlu1 %1395  ;;  %v1270_v5 = vpop.permute.xlu0 %1269 }
 0x238   : > { %v1794_v39 = vsel %vm1769_vm7, %v1761_v60, %v1396_v15  ;;  %v1762_v4 = vsel %vm1736_vm6, %v1729_v56, %v1270_v5 }
 0x239   : > { %v2805_v43 = vpop.f32.mrb[4].mxu0 }
 0x23a   : > { %2344 = vst.msk [vmem:[%s4071_s23 + $0x28] sm:$0xff] %vm1604_vm2, %v2805_v43  ;;  %v2027_v44 = vpop.f32.mrb[5].mxu0  ;;  %v2242_v12 = vmul.f32 %v2805_v43, %v2805_v43  ;;  %v2175_v38 = vsel %vm1604_vm2, %v2805_v43, 0.0 }
 0x23b   : > { %v2173_v45 = vsel %vm1604_vm2, %v2027_v44, 0.0  ;;  %v2241_v63 = vmul.f32 %v2027_v44, %v2027_v44  ;;  %2343 = vst.msk [vmem:[%s4071_s23 + $0x20] sm:$0xff] %vm1604_vm2, %v2027_v44  ;;  %v1016_v23 = vpop.permute.xlu1 %1015  ;;  %v4147_v32 = vpop.permute.xlu0 %889 }
 0x23c   : > { %v2174_v59 = vadd.f32 %v2173_v45, %v2172_v42  ;;  %v2278_v36 = vsel %vm1604_vm2, %v2242_v12, 0.0  ;;  %v1697_v13 = vsel %vm1670_vm4, %v1664_v21, %v1016_v23 }
 0x23d   : > { %v2276_v20 = vsel %vm1604_vm2, %v2241_v63, 0.0  ;;  %v4459_v63 = vld [vmem:[#allocation20_spill] sm:$0xff] }
 0x23e   : > { %v2277_v30 = vadd.f32 %v2276_v20, %v2275_v57  ;;  %v2176_v26 = vadd.f32 %v2175_v38, %v2174_v59  ;;  %v1599_v2 = vsel %vm1571_vm0, %v284_v17, %v4459_v63 }
 0x23f   : > { %v1524_v11 = vpop.permute.xlu1 %1523  ;;  %v1398_v31 = vpop.permute.xlu0 %1397  ;;  %v1632_v23 = vsel %vm1604_vm2, %v1599_v2, %v4460_v35 }
 0x240   : > { %v1827_v51 = vsel %vm1802_vm8, %v1794_v39, %v1524_v11  ;;  %v2279_v47 = vadd.f32 %v2278_v36, %v2277_v30  ;;  %v1795_v49 = vsel %vm1769_vm7, %v1762_v4, %v1398_v31  ;;  %v1665_v59 = vsel %vm1637_vm3, %v1632_v23, %v4147_v32 }
 0x241   : > { %2833 = vmatprep.mubr.msk.f32.mxu1 %vm1840_vm9, %v1827_v51 }
 0x243   : > { %v1144_v19 = vpop.permute.xlu1 %1143  ;;  %v1018_v29 = vpop.permute.xlu0 %1017 }
 0x244   : > { %v1730_v43 = vsel %vm1703_vm5, %v1697_v13, %v1144_v19  ;;  %v1698_v20 = vsel %vm1670_vm4, %v1665_v59, %v1018_v29  ;;  %v285_v29 = vld [vmem:[%s2973_s22 + $0x150] sm:$0xff] }
 0x245   : > { %v288_v59 = vld [vmem:[%s2973_s22 + $0x170] sm:$0xff] }
 0x247   : > { %v1146_v9 = vpop.permute.xlu1 %1145  ;;  %v1526_v61 = vpop.permute.xlu0 %1525 }
 0x248   : > { %v1828_v55 = vsel %vm1802_vm8, %v1795_v49, %v1526_v61  ;;  %v1731_v60 = vsel %vm1703_vm5, %v1698_v20, %v1146_v9 }
 0x249   : > { %2834 = vmatmul.mubr.msk.f32.gmra.mrb[8].mxu1 %vm1840_vm9, %v1828_v55  ;;  %v4461_v55 = vld [vmem:[#allocation23_spill] sm:$0xff] }
 0x24b   : > { %v4171_v46 = vpop.permute.xlu1 %891  ;;  %v1272_v37 = vpop.permute.xlu0 %1271 }
 0x24c   : > { %v1763_v14 = vsel %vm1736_vm6, %v1730_v43, %v1272_v37  ;;  %v1600_v37 = vsel %vm1571_vm0, %v285_v29, %v4461_v55 }
 0x24d   : > { %v2808_v6 = vpop.f32.mrb[6].mxu0 }
 0x24e   : > { %2346 = vst.msk [vmem:[%s4071_s23 + $0x38] sm:$0xff] %vm1604_vm2, %v2808_v6  ;;  %v2037_v48 = vpop.f32.mrb[7].mxu0  ;;  %v2244_v41 = vmul.f32 %v2808_v6, %v2808_v6  ;;  %v2179_v57 = vsel %vm1604_vm2, %v2808_v6, 0.0  ;;  %v4462_v6 = vld [vmem:[#allocation43_spill] sm:$0xff] }
 0x24f   : > { %v2177_v1 = vsel %vm1604_vm2, %v2037_v48, 0.0  ;;  %v2243_v42 = vmul.f32 %v2037_v48, %v2037_v48  ;;  %2345 = vst.msk [vmem:[%s4071_s23 + $0x30] sm:$0xff] %vm1604_vm2, %v2037_v48  ;;  %v1400_v28 = vpop.permute.xlu1 %1399  ;;  %v1274_v0 = vpop.permute.xlu0 %1273  ;;  %v1633_v22 = vsel %vm1604_vm2, %v1600_v37, %v4462_v6 }
 0x250   : > { %v2178_v25 = vadd.f32 %v2177_v1, %v2176_v26  ;;  %v2282_v34 = vsel %vm1604_vm2, %v2244_v41, 0.0  ;;  %v1796_v44 = vsel %vm1769_vm7, %v1763_v14, %v1400_v28  ;;  %v1764_v30 = vsel %vm1736_vm6, %v1731_v60, %v1274_v0  ;;  %v286_v0 = vld [vmem:[%s2973_s22 + $0x158] sm:$0xff] }
 0x251   : > { %v2280_v10 = vsel %vm1604_vm2, %v2243_v42, 0.0  ;;  %v1666_v48 = vsel %vm1637_vm3, %v1633_v22, %v4171_v46  ;;  %v1601_v18 = vsel %vm1571_vm0, %v286_v0, %v4463_v52  ;;  %v4464_v46 = vld [vmem:[#allocation42_spill] sm:$0xff] }
 0x252   : > { %v2281_v27 = vadd.f32 %v2280_v10, %v2279_v47  ;;  %v2180_v54 = vadd.f32 %v2179_v57, %v2178_v25 }
 0x253   : > { %v1020_v15 = vpop.permute.xlu1 %1019  ;;  %v894_v5 = vpop.permute.xlu0 %893 }
 0x254   : > { %v2283_v33 = vadd.f32 %v2282_v34, %v2281_v27  ;;  %v1699_v42 = vsel %vm1670_vm4, %v1666_v48, %v1020_v15  ;;  %v1634_v27 = vsel %vm1604_vm2, %v1601_v18, %v4464_v46 }
 0x257   : > { %v1528_v8 = vpop.permute.xlu1 %1527  ;;  %v1402_v12 = vpop.permute.xlu0 %1401 }
 0x258   : > { %v1829_v45 = vsel %vm1802_vm8, %v1796_v44, %v1528_v8  ;;  %v1797_v26 = vsel %vm1769_vm7, %v1764_v30, %v1402_v12 }
 0x259   : > { %2836 = vmatprep.mubr.msk.f32.mxu1 %vm1840_vm9, %v1829_v45 }
 0x25b   : > { %v1148_v53 = vpop.permute.xlu1 %1147  ;;  %v1022_v38 = vpop.permute.xlu0 %1021 }
 0x25c   : > { %v1732_v28 = vsel %vm1703_vm5, %v1699_v42, %v1148_v53  ;;  %v287_v53 = vld [vmem:[%s2973_s22 + $0x168] sm:$0xff] }
 0x25f   : > { %v1150_v39 = vpop.permute.xlu1 %1149  ;;  %v1530_v36 = vpop.permute.xlu0 %1529 }
 0x260   : > { %v1830_v11 = vsel %vm1802_vm8, %v1797_v26, %v1530_v36  ;;  %v4465_v36 = vld [vmem:[#allocation24_spill] sm:$0xff] }
 0x261   : > { %v2811_v31 = vpop.f32.mrb[8].mxu0  ;;  %2837 = vmatmul.mubr.msk.f32.gmra.mrb[10].mxu1 %vm1840_vm9, %v1830_v11  ;;  %v1603_v11 = vsel %vm1571_vm0, %v288_v59, %v4465_v36 }
 0x262   : > { %2348 = vst.msk [vmem:[%s4071_s23 + $0x48] sm:$0xff] %vm1604_vm2, %v2811_v31  ;;  %v2047_v32 = vpop.f32.mrb[9].mxu0  ;;  %v2246_v51 = vmul.f32 %v2811_v31, %v2811_v31  ;;  %v2183_v40 = vsel %vm1604_vm2, %v2811_v31, 0.0  ;;  %v4466_v31 = vld [vmem:[#allocation25_spill] sm:$0xff] }
 0x263   : > { %v2181_v47 = vsel %vm1604_vm2, %v2047_v32, 0.0  ;;  %v2245_v58 = vmul.f32 %v2047_v32, %v2047_v32  ;;  %2347 = vst.msk [vmem:[%s4071_s23 + $0x40] sm:$0xff] %vm1604_vm2, %v2047_v32  ;;  %v896_v24 = vpop.permute.xlu1 %895  ;;  %v1276_v16 = vpop.permute.xlu0 %1275  ;;  %v1602_v32 = vsel %vm1571_vm0, %v287_v53, %v4466_v31 }
 0x264   : > { %v2182_v7 = vadd.f32 %v2181_v47, %v2180_v54  ;;  %v2286_v4 = vsel %vm1604_vm2, %v2246_v51, 0.0  ;;  %v1765_v25 = vsel %vm1736_vm6, %v1732_v28, %v1276_v16  ;;  %v1667_v54 = vsel %vm1637_vm3, %v1634_v27, %v894_v5  ;;  %v4467_v51 = vld [vmem:[#allocation44_spill] sm:$0xff] }
 0x265   : > { %v2284_v19 = vsel %vm1604_vm2, %v2245_v58, 0.0  ;;  %v1700_v15 = vsel %vm1670_vm4, %v1667_v54, %v1022_v38  ;;  %v1636_v47 = vsel %vm1604_vm2, %v1603_v11, %v4467_v51  ;;  %v4468_v58 = vld [vmem:[#allocation45_spill] sm:$0xff] }
 0x266   : > { %v2285_v50 = vadd.f32 %v2284_v19, %v2283_v33  ;;  %v2184_v56 = vadd.f32 %v2183_v40, %v2182_v7  ;;  %v1733_v13 = vsel %vm1703_vm5, %v1700_v15, %v1150_v39  ;;  %v1635_v16 = vsel %vm1604_vm2, %v1602_v32, %v4468_v58 }
 0x267   : > { %v1404_v49 = vpop.permute.xlu1 %1403  ;;  %v1278_v9 = vpop.permute.xlu0 %1277  ;;  %v1668_v7 = vsel %vm1637_vm3, %v1635_v16, %v896_v24 }
 0x268   : > { %v2287_v61 = vadd.f32 %v2286_v4, %v2285_v50  ;;  %v1798_v62 = vsel %vm1769_vm7, %v1765_v25, %v1404_v49  ;;  %v1766_v43 = vsel %vm1736_vm6, %v1733_v13, %v1278_v9 }
 0x26b   : > { %v1024_v41 = vpop.permute.xlu1 %1023  ;;  %v898_v1 = vpop.permute.xlu0 %897 }
 0x26c   : > { %v1669_v40 = vsel %vm1637_vm3, %v1636_v47, %v898_v1  ;;  %v1701_v50 = vsel %vm1670_vm4, %v1668_v7, %v1024_v41 }
 0x26f   : > { %v1532_v3 = vpop.permute.xlu1 %1531  ;;  %v1406_v57 = vpop.permute.xlu0 %1405 }
 0x270   : > { %v1831_v10 = vsel %vm1802_vm8, %v1798_v62, %v1532_v3  ;;  %v1799_v14 = vsel %vm1769_vm7, %v1766_v43, %v1406_v57 }
 0x271   : > { %2839 = vmatprep.mubr.msk.f32.mxu1 %vm1840_vm9, %v1831_v10 }
 0x273   : > { %v1152_v21 = vpop.permute.xlu1 %1151  ;;  %v1026_v34 = vpop.permute.xlu0 %1025 }
 0x274   : > { %v1734_v4 = vsel %vm1703_vm5, %v1701_v50, %v1152_v21 }
 0x275   : > { %v2814_v33 = vpop.f32.mrb[10].mxu0 }
 0x276   : > { %2350 = vst.msk [vmem:[%s4071_s23 + $0x58] sm:$0xff] %vm1604_vm2, %v2814_v33  ;;  %v2057_v17 = vpop.f32.mrb[11].mxu0  ;;  %v2248_v44 = vmul.f32 %v2814_v33, %v2814_v33  ;;  %v2187_v35 = vsel %vm1604_vm2, %v2814_v33, 0.0 }
 0x277   : > { %v2185_v8 = vsel %vm1604_vm2, %v2057_v17, 0.0  ;;  %v2247_v5 = vmul.f32 %v2057_v17, %v2057_v17  ;;  %2349 = vst.msk [vmem:[%s4071_s23 + $0x50] sm:$0xff] %vm1604_vm2, %v2057_v17  ;;  %v1154_v12 = vpop.permute.xlu1 %1153  ;;  %v1534_v45 = vpop.permute.xlu0 %1533 }
 0x278   : > { %v2186_v63 = vadd.f32 %v2185_v8, %v2184_v56  ;;  %v1832_v2 = vsel %vm1802_vm8, %v1799_v14, %v1534_v45  ;;  %v2290_v60 = vsel %vm1604_vm2, %v2248_v44, 0.0  ;;  %v1702_v56 = vsel %vm1670_vm4, %v1669_v40, %v1026_v34 }
 0x279   : > { %v2288_v23 = vsel %vm1604_vm2, %v2247_v5, 0.0  ;;  %2840 = vmatmul.mubr.msk.f32.gmra.mrb[12].mxu1 %vm1840_vm9, %v1832_v2  ;;  %v1735_v49 = vsel %vm1703_vm5, %v1702_v56, %v1154_v12 }
 0x27a   : > { %v2289_v38 = vadd.f32 %v2288_v23, %v2287_v61  ;;  %v2188_v20 = vadd.f32 %v2187_v35, %v2186_v63 }
 0x27b   : > { %v1282_v30 = vpop.permute.xlu1 %1281  ;;  %v1280_v26 = vpop.permute.xlu0 %1279 }
 0x27c   : > { %v2291_v39 = vadd.f32 %v2290_v60, %v2289_v38  ;;  %v1768_v9 = vsel %vm1736_vm6, %v1735_v49, %v1282_v30  ;;  %v1767_v61 = vsel %vm1736_vm6, %v1734_v4, %v1280_v26 }
 0x27f   : > { %v1410_v19 = vpop.permute.xlu1 %1409  ;;  %v1408_v29 = vpop.permute.xlu0 %1407 }
 0x280   : > { %v1801_v24 = vsel %vm1769_vm7, %v1768_v9, %v1410_v19  ;;  %v1800_v55 = vsel %vm1769_vm7, %v1767_v61, %v1408_v29 }
 0x283   : > { %v1538_v37 = vpop.permute.xlu1 %1537  ;;  %v1536_v6 = vpop.permute.xlu0 %1535 }
 0x284   : > { %v1834_v22 = vsel %vm1802_vm8, %v1801_v24, %v1538_v37  ;;  %v1833_v48 = vsel %vm1802_vm8, %v1800_v55, %v1536_v6 }
 0x285   : > { %2842 = vmatprep.mubr.msk.f32.mxu1 %vm1840_vm9, %v1833_v48 }
 0x286   : > { %2843 = vmatmul.mubr.msk.f32.gmra.mrb[14].mxu1 %vm1840_vm9, %v1834_v22 }
 0x28d   : > { %v2817_v41 = vpop.f32.mrb[12].mxu0 }
 0x28e   : > { %2352 = vst.msk [vmem:[%s4071_s23 + $0x68] sm:$0xff] %vm1604_vm2, %v2817_v41  ;;  %v2067_v1 = vpop.f32.mrb[13].mxu0  ;;  %v2250_v42 = vmul.f32 %v2817_v41, %v2817_v41  ;;  %v2191_v62 = vsel %vm1604_vm2, %v2817_v41, 0.0 }
 0x28f   : > { %v2189_v28 = vsel %vm1604_vm2, %v2067_v1, 0.0  ;;  %v2249_v0 = vmul.f32 %v2067_v1, %v2067_v1  ;;  %2351 = vst.msk [vmem:[%s4071_s23 + $0x60] sm:$0xff] %vm1604_vm2, %v2067_v1 }
 0x290   : > { %v2190_v25 = vadd.f32 %v2189_v28, %v2188_v20  ;;  %v2294_v52 = vsel %vm1604_vm2, %v2250_v42, 0.0 }
 0x291   : > { %v2292_v3 = vsel %vm1604_vm2, %v2249_v0, 0.0 }
 0x292   : > { %v2293_v57 = vadd.f32 %v2292_v3, %v2291_v39  ;;  %v2192_v10 = vadd.f32 %v2191_v62, %v2190_v25 }
 0x294   : > { %v2295_v18 = vadd.f32 %v2294_v52, %v2293_v57 }
 0x2a5   : > { %v2820_v46 = vpop.f32.mrb[14].mxu0 }
 0x2a6   : > { %2354 = vst.msk [vmem:[%s4071_s23 + $0x78] sm:$0xff] %vm1604_vm2, %v2820_v46  ;;  %v2077_v27 = vpop.f32.mrb[15].mxu0  ;;  %v2252_v54 = vmul.f32 %v2820_v46, %v2820_v46  ;;  %v2195_v13 = vsel %vm1604_vm2, %v2820_v46, 0.0 }
 0x2a7   : > { %v2193_v21 = vsel %vm1604_vm2, %v2077_v27, 0.0  ;;  %v2251_v34 = vmul.f32 %v2077_v27, %v2077_v27  ;;  %2353 = vst.msk [vmem:[%s4071_s23 + $0x70] sm:$0xff] %vm1604_vm2, %v2077_v27 }
 0x2a8   : > { %v2194_v15 = vadd.f32 %v2193_v21, %v2192_v10  ;;  %v2298_v14 = vsel %vm1604_vm2, %v2252_v54, 0.0 }
 0x2a9   : > { %v2296_v33 = vsel %vm1604_vm2, %v2251_v34, 0.0 }
 0x2aa   : > { %v2196_v43 = vadd.f32 %v2195_v13, %v2194_v15  ;;  %v2297_v17 = vadd.f32 %v2296_v33, %v2295_v18 }
 0x2ac   : > { %v2299_v44 = vadd.f32 %v2298_v14, %v2297_v17 }
 0x2bd   : > { %v2823_v8 = vpop.f32.mrb[0].mxu1 }
 0x2be   : > { %2356 = vst.msk [vmem:[%s4071_s23 + $0x88] sm:$0xff] %vm1604_vm2, %v2823_v8  ;;  %v2087_v5 = vpop.f32.mrb[1].mxu1  ;;  %v2254_v12 = vmul.f32 %v2823_v8, %v2823_v8  ;;  %v2199_v35 = vsel %vm1604_vm2, %v2823_v8, 0.0 }
 0x2bf   : > { %v2197_v45 = vsel %vm1604_vm2, %v2087_v5, 0.0  ;;  %v2253_v63 = vmul.f32 %v2087_v5, %v2087_v5  ;;  %2355 = vst.msk [vmem:[%s4071_s23 + $0x80] sm:$0xff] %vm1604_vm2, %v2087_v5 }
 0x2c0   : > { %v2198_v2 = vadd.f32 %v2197_v45, %v2196_v43  ;;  %v2302_v38 = vsel %vm1604_vm2, %v2254_v12, 0.0 }
 0x2c1   : > { %v2300_v23 = vsel %vm1604_vm2, %v2253_v63, 0.0 }
 0x2c2   : > { %v2301_v59 = vadd.f32 %v2300_v23, %v2299_v44  ;;  %v2200_v53 = vadd.f32 %v2199_v35, %v2198_v2 }
 0x2c4   : > { %v2303_v20 = vadd.f32 %v2302_v38, %v2301_v59 }
 0x2d5   : > { %v2826_v60 = vpop.f32.mrb[2].mxu1 }
 0x2d6   : > { %2358 = vst.msk [vmem:[%s4071_s23 + $0x98] sm:$0xff] %vm1604_vm2, %v2826_v60  ;;  %v2097_v30 = vpop.f32.mrb[3].mxu1  ;;  %v2256_v26 = vmul.f32 %v2826_v60, %v2826_v60  ;;  %v2203_v31 = vsel %vm1604_vm2, %v2826_v60, 0.0 }
 0x2d7   : > { %v2201_v39 = vsel %vm1604_vm2, %v2097_v30, 0.0  ;;  %v2255_v36 = vmul.f32 %v2097_v30, %v2097_v30  ;;  %2357 = vst.msk [vmem:[%s4071_s23 + $0x90] sm:$0xff] %vm1604_vm2, %v2097_v30 }
 0x2d8   : > { %v2202_v11 = vadd.f32 %v2201_v39, %v2200_v53  ;;  %v2306_v58 = vsel %vm1604_vm2, %v2256_v26, 0.0 }
 0x2d9   : > { %v2304_v32 = vsel %vm1604_vm2, %v2255_v36, 0.0 }
 0x2da   : > { %v2305_v51 = vadd.f32 %v2304_v32, %v2303_v20  ;;  %v2204_v47 = vadd.f32 %v2203_v31, %v2202_v11 }
 0x2dc   : > { %v2307_v16 = vadd.f32 %v2306_v58, %v2305_v51 }
 0x2ec   : > { %v2829_v7 = vpop.f32.mrb[4].mxu1 }
 0x2ed   : > { %2360 = vst.msk [vmem:[%s4071_s23 + $0xa8] sm:$0xff] %vm1604_vm2, %v2829_v7  ;;  %v2107_v40 = vpop.f32.mrb[5].mxu1  ;;  %v2258_v19 = vmul.f32 %v2829_v7, %v2829_v7  ;;  %v2207_v4 = vsel %vm1604_vm2, %v2829_v7, 0.0 }
 0x2ee   : > { %v2205_v29 = vsel %vm1604_vm2, %v2107_v40, 0.0  ;;  %v2257_v50 = vmul.f32 %v2107_v40, %v2107_v40  ;;  %2359 = vst.msk [vmem:[%s4071_s23 + $0xa0] sm:$0xff] %vm1604_vm2, %v2107_v40 }
 0x2ef   : > { %v2206_v56 = vadd.f32 %v2205_v29, %v2204_v47  ;;  %v2310_v24 = vsel %vm1604_vm2, %v2258_v19, 0.0 }
 0x2f0   : > { %v2308_v49 = vsel %vm1604_vm2, %v2257_v50, 0.0 }
 0x2f1   : > { %v2309_v9 = vadd.f32 %v2308_v49, %v2307_v16  ;;  %v2208_v61 = vadd.f32 %v2207_v4, %v2206_v56 }
 0x2f3   : > { %v2311_v55 = vadd.f32 %v2310_v24, %v2309_v9 }
 0x304   : > { %v2832_v37 = vpop.f32.mrb[6].mxu1 }
 0x305   : > { %2362 = vst.msk [vmem:[%s4071_s23 + $0xb8] sm:$0xff] %vm1604_vm2, %v2832_v37  ;;  %v2117_v6 = vpop.f32.mrb[7].mxu1  ;;  %v2260_v22 = vmul.f32 %v2832_v37, %v2832_v37  ;;  %v2211_v42 = vsel %vm1604_vm2, %v2832_v37, 0.0 }
 0x306   : > { %v2209_v48 = vsel %vm1604_vm2, %v2117_v6, 0.0  ;;  %v2259_v41 = vmul.f32 %v2117_v6, %v2117_v6  ;;  %2361 = vst.msk [vmem:[%s4071_s23 + $0xb0] sm:$0xff] %vm1604_vm2, %v2117_v6 }
 0x307   : > { %v2210_v1 = vadd.f32 %v2209_v48, %v2208_v61  ;;  %v2314_v62 = vsel %vm1604_vm2, %v2260_v22, 0.0 }
 0x308   : > { %v2312_v28 = vsel %vm1604_vm2, %v2259_v41, 0.0 }
 0x309   : > { %v2313_v0 = vadd.f32 %v2312_v28, %v2311_v55  ;;  %v2212_v25 = vadd.f32 %v2211_v42, %v2210_v1 }
 0x30b   : > { %v2315_v3 = vadd.f32 %v2314_v62, %v2313_v0 }
 0x31c   : > { %v2835_v57 = vpop.f32.mrb[8].mxu1 }
 0x31d   : > { %2364 = vst.msk [vmem:[%s4071_s23 + $0xc8] sm:$0xff] %vm1604_vm2, %v2835_v57  ;;  %v2127_v10 = vpop.f32.mrb[9].mxu1  ;;  %v2262_v52 = vmul.f32 %v2835_v57, %v2835_v57  ;;  %v2215_v54 = vsel %vm1604_vm2, %v2835_v57, 0.0 }
 0x31e   : > { %v2213_v18 = vsel %vm1604_vm2, %v2127_v10, 0.0  ;;  %v2261_v46 = vmul.f32 %v2127_v10, %v2127_v10  ;;  %2363 = vst.msk [vmem:[%s4071_s23 + $0xc0] sm:$0xff] %vm1604_vm2, %v2127_v10 }
 0x31f   : > { %v2214_v27 = vadd.f32 %v2213_v18, %v2212_v25  ;;  %v2318_v13 = vsel %vm1604_vm2, %v2262_v52, 0.0 }
 0x320   : > { %v2316_v21 = vsel %vm1604_vm2, %v2261_v46, 0.0 }
 0x321   : > { %v2317_v34 = vadd.f32 %v2316_v21, %v2315_v3  ;;  %v2216_v15 = vadd.f32 %v2215_v54, %v2214_v27 }
 0x323   : > { %v2319_v33 = vadd.f32 %v2318_v13, %v2317_v34 }
 0x334   : > { %v2838_v43 = vpop.f32.mrb[10].mxu1 }
 0x335   : > { %2366 = vst.msk [vmem:[%s4071_s23 + $0xd8] sm:$0xff] %vm1604_vm2, %v2838_v43  ;;  %v2137_v17 = vpop.f32.mrb[11].mxu1  ;;  %v2264_v14 = vmul.f32 %v2838_v43, %v2838_v43  ;;  %v2219_v12 = vsel %vm1604_vm2, %v2838_v43, 0.0 }
 0x336   : > { %v2217_v44 = vsel %vm1604_vm2, %v2137_v17, 0.0  ;;  %v2263_v8 = vmul.f32 %v2137_v17, %v2137_v17  ;;  %2365 = vst.msk [vmem:[%s4071_s23 + $0xd0] sm:$0xff] %vm1604_vm2, %v2137_v17 }
 0x337   : > { %v2218_v5 = vadd.f32 %v2217_v44, %v2216_v15  ;;  %v2322_v35 = vsel %vm1604_vm2, %v2264_v14, 0.0 }
 0x338   : > { %v2320_v45 = vsel %vm1604_vm2, %v2263_v8, 0.0 }
 0x339   : > { %v2321_v63 = vadd.f32 %v2320_v45, %v2319_v33  ;;  %v2220_v2 = vadd.f32 %v2219_v12, %v2218_v5 }
 0x33b   : > { %v2323_v23 = vadd.f32 %v2322_v35, %v2321_v63 }
 0x34c   : > { %v2841_v59 = vpop.f32.mrb[12].mxu1 }
 0x34d   : > { %2368 = vst.msk [vmem:[%s4071_s23 + $0xe8] sm:$0xff] %vm1604_vm2, %v2841_v59  ;;  %v2147_v53 = vpop.f32.mrb[13].mxu1  ;;  %v2266_v38 = vmul.f32 %v2841_v59, %v2841_v59  ;;  %v2223_v26 = vsel %vm1604_vm2, %v2841_v59, 0.0 }
 0x34e   : > { %v2221_v20 = vsel %vm1604_vm2, %v2147_v53, 0.0  ;;  %v2265_v60 = vmul.f32 %v2147_v53, %v2147_v53  ;;  %2367 = vst.msk [vmem:[%s4071_s23 + $0xe0] sm:$0xff] %vm1604_vm2, %v2147_v53 }
 0x34f   : > { %v2222_v30 = vadd.f32 %v2221_v20, %v2220_v2  ;;  %v2326_v31 = vsel %vm1604_vm2, %v2266_v38, 0.0 }
 0x350   : > { %v2324_v39 = vsel %vm1604_vm2, %v2265_v60, 0.0 }
 0x351   : > { %v2325_v36 = vadd.f32 %v2324_v39, %v2323_v23  ;;  %v2224_v11 = vadd.f32 %v2223_v26, %v2222_v30 }
 0x353   : > { %v2327_v32 = vadd.f32 %v2326_v31, %v2325_v36 }
 0x359   : > { %v2844_v51 = vpop.f32.mrb[14].mxu1 }
 0x35a   : > { %2370 = vst.msk [vmem:[%s4071_s23 + $0xf8] sm:$0xff] %vm1604_vm2, %v2844_v51  ;;  %v2157_v47 = vpop.f32.mrb[15].mxu1  ;;  %v2268_v58 = vmul.f32 %v2844_v51, %v2844_v51  ;;  %v2227_v19 = vsel %vm1604_vm2, %v2844_v51, 0.0 }
 0x35b   : > { %v2225_v16 = vsel %vm1604_vm2, %v2157_v47, 0.0  ;;  %v2267_v7 = vmul.f32 %v2157_v47, %v2157_v47  ;;  %2369 = vst.msk [vmem:[%s4071_s23 + $0xf0] sm:$0xff] %vm1604_vm2, %v2157_v47 }
 0x35c   : > { %v2226_v40 = vadd.f32 %v2225_v16, %v2224_v11  ;;  %v2330_v4 = vsel %vm1604_vm2, %v2268_v58, 0.0 }
 0x35d   : > { %v2328_v29 = vsel %vm1604_vm2, %v2267_v7, 0.0 }
 0x35e   : > { %v2228_v50 = vadd.f32 %v2227_v19, %v2226_v40  ;;  %v2329_v56 = vadd.f32 %v2328_v29, %v2327_v32 }
 0x360   : > { %v2229_v49 = vrot.slane %v2228_v50, 4  ;;  %v2331_v9 = vadd.f32 %v2330_v4, %v2329_v56 }
 0x362   : > { %v2230_v61 = vadd.f32 %v2229_v49, %v2228_v50  ;;  %v2332_v24 = vrot.slane %v2331_v9, 4 }
 0x364   : > { %v2231_v55 = vrot.slane %v2230_v61, 2  ;;  %v2333_v37 = vadd.f32 %v2332_v24, %v2331_v9 }
 0x366   : > { %v2232_v6 = vadd.f32 %v2231_v55, %v2230_v61  ;;  %v2334_v22 = vrot.slane %v2333_v37, 2 }
 0x368   : > { %v2233_v48 = vrot.slane %v2232_v6, 1  ;;  %v2335_v41 = vadd.f32 %v2334_v22, %v2333_v37 }
 0x36a   : > { %v2234_v1 = vadd.f32 %v2233_v48, %v2232_v6  ;;  %v2336_v42 = vrot.slane %v2335_v41, 1 }
 0x36c   : > { %2236 = vst.msk [vmem:[%s250_s25] sm:$0x1] %vm2235_vm10, %v2234_v1  ;;  %v2337_v28 = vadd.f32 %v2336_v42, %v2335_v41 }
 0x36e   : > { %2338 = vst.msk [vmem:[%s255_s28] sm:$0x1] %vm2235_vm10, %v2337_v28 }
 0x36f PF: > { %s15_s17 = sadd.s32 1, %s2914_s17   ;;  %s4469_s15 = smov %s2910_s16 }
 0x370   : > { %p12_p5 = scmp.ge.s32.totalorder %s15_s17, 4   ;;  %s4470_s16 = smov %s4472_s18 }
 0x372   :  { %14 = sbr.rel (!%p12_p5) target bundleno = 2 (0x2), region = 84 }

</bundles_post_ra>
